<compile_context>
chip_gen: v6e
topology: v6e:2x2x1
jax: 0.10.0
libtpu: 0.0.40
codegen_flags: <defaults>
</compile_context>

<pallas_src>
import functools

import numpy as np
import jax
import jax.numpy as jnp
from jax.experimental import pallas as pl
from jax.experimental.pallas import tpu as pltpu


LAYERS = [4, 8, 16, 32, 64, 64, 128, 128, 128]
NUM_CLASSES = 20
BN_EPS = 1e-5
LANE = 128


def _round_up(x, m):
    return ((x + m - 1) // m) * m


def _conv_out(size):
    return (size + 2 * 1 - 3) // 2 + 1


# --------------------------------------------------------------------------- #
# Parameter init (matches the PyTorch module: kaiming_normal_(a=0.1) conv
# weights, zero conv bias, eval-mode BatchNorm2d defaults, default Linear init)
# --------------------------------------------------------------------------- #
def init_params(key):
    params = {"conv": []}
    in_ch = 1
    for v in LAYERS:
        key, wk = jax.random.split(key)
        fan_in = in_ch * 3 * 3
        a = 0.1
        gain = (2.0 / (1.0 + a * a)) ** 0.5          # kaiming_normal_(a=0.1), fan_in mode
        std = gain / (fan_in ** 0.5)
        w = jax.random.normal(wk, (v, in_ch, 3, 3), jnp.float32) * std
        conv_bias = jnp.zeros((v,), jnp.float32)
        # Eval-mode BatchNorm2d, full fold (defaults: gamma=1, beta=0, mean=0, var=1).
        gamma = jnp.ones((v,), jnp.float32)
        beta = jnp.zeros((v,), jnp.float32)
        running_mean = jnp.zeros((v,), jnp.float32)
        running_var = jnp.ones((v,), jnp.float32)
        inv_std = 1.0 / jnp.sqrt(running_var + BN_EPS)
        fused_scale = gamma * inv_std                # folded into the weight matrices
        fused_bias = (conv_bias - running_mean) * fused_scale + beta
        params["conv"].append((w, fused_scale, fused_bias))
        in_ch = v
    key, wk, bk = jax.random.split(key, 3)
    bound = 1.0 / (LAYERS[-1] ** 0.5)                # PyTorch default Linear init
    params["lin_w"] = jax.random.uniform(wk, (NUM_CLASSES, LAYERS[-1]), jnp.float32, -bound, bound)
    params["lin_b"] = jax.random.uniform(bk, (NUM_CLASSES,), jnp.float32, -bound, bound)
    return params


# --------------------------------------------------------------------------- #
# Host-side builder: packs all constant matrices (bf16) + a static plan that
# the kernel unrolls over, plus per-layer DMA chunk row ranges.
# --------------------------------------------------------------------------- #
def build_fused_network(params, batch, h0, w0):
    raw = []                                          # raw f32 matrices, registration order

    def register(m):
        raw.append(np.asarray(m, np.float32))
        return len(raw) - 1

    chunk_ranges = []                                 # (first_mat_id, last_mat_id_exclusive)
    layers_plan = []
    bias_rows = []
    flops = 0

    n = batch
    h, w, c = h0, w0, 1
    r_in = n * h0                                     # (padded) row count of current activation
    l_in = _round_up(w0 * 1, LANE)                    # lane count (layer-1 input lane-padded)

    for (wt, scale, bias) in params["conv"]:
        cout, cin = wt.shape[0], wt.shape[1]
        assert cin == c
        ho, wo = _conv_out(h), _conv_out(w)
        lout = wo * cout
        wt_np = np.asarray(wt, np.float32) * np.asarray(scale, np.float32)[:, None, None, None]

        khs = [kh for kh in range(3)
               if any(0 <= 2 * i + kh - 1 < h for i in range(ho))]
        nblk = len(khs)
        p8 = _round_up(n * ho, 8)
        chunk_start = len(raw)

        def fill_m(dst, row_off, kh):
            for j in range(wo):
                for kw in range(3):
                    win = 2 * j + kw - 1
                    if 0 <= win < w:
                        dst[row_off + win * cin:row_off + (win + 1) * cin,
                            j * cout:(j + 1) * cout] = wt_np[:, :, kh, kw].T

        if nblk == 1 and h == 1:
            # 1x1-spatial layer: row selection is the identity -> single GEMM A @ M.
            m = np.zeros((l_in, lout), np.float32)
            fill_m(m, 0, khs[0])
            s_id, m_id = None, register(m)
            r_out = r_in
            flops += 2 * r_in * l_in * lout
        else:
            # S_stack: nblk row-selection blocks (each padded to p8 rows), stacked vertically.
            # Zero rows encode the H zero-padding; columns >= n*h (previous padding rows) are
            # never selected, so "garbage" padding rows in the activation are harmless.
            s = np.zeros((nblk * p8, r_in), np.float32)
            for t, kh in enumerate(khs):
                for b in range(n):
                    for i in range(ho):
                        hin = 2 * i + kh - 1
                        if 0 <= hin < h:
                            s[t * p8 + b * ho + i, b * h + hin] = 1.0
            # M_cat: the per-kernel-row band matrices (kw taps, stride-2, W padding, BN scale
            # folded) stacked along K so the kh accumulation happens inside one MXU dot.
            m = np.zeros((nblk * l_in, lout), np.float32)
            for t, kh in enumerate(khs):
                fill_m(m, t * l_in, kh)
            s_id, m_id = register(s), register(m)
            r_out = p8
            flops += 2 * (nblk * p8) * r_in * l_in    # SA     = S_stack @ A
            flops += 2 * p8 * (nblk * l_in) * lout    # Y      = SA_cat  @ M_cat

        brow = np.zeros((lout,), np.float32)
        bias_np = np.asarray(bias, np.float32)
        for j in range(wo):
            brow[j * cout:(j + 1) * cout] = bias_np
        layers_plan.append({"s": s_id, "m": m_id, "nblk": nblk, "p8": p8,
                            "lout": lout, "bias_row": len(bias_rows)})
        bias_rows.append(brow)
        chunk_ranges.append((chunk_start, len(raw)))

        h, w, c = ho, wo, cout
        r_in, l_in = r_out, lout

    # AdaptiveAvgPool2d(1) + Linear: column-pool folded into the linear weight; a row-pool
    # matrix is only needed if the final spatial H > 1.
    chunk_start = len(raw)
    row_pool_id = None
    if h > 1:
        pr = np.zeros((n, r_in), np.float32)
        for b in range(n):
            pr[b, b * h:(b + 1) * h] = 1.0 / h
        row_pool_id = register(pr)
        flops += 2 * n * r_in * l_in
    lin_w = np.asarray(params["lin_w"], np.float32)   # (num_classes, c)
    lf = np.zeros((l_in, NUM_CLASSES), np.float32)
    for j in range(w):
        lf[j * c:(j + 1) * c, :] = lin_w.T / w
    head_id = register(lf)
    flops += 2 * n * l_in * NUM_CLASSES
    lin_bias_row = len(bias_rows)
    bias_rows.append(np.asarray(params["lin_b"], np.float32))
    chunk_ranges.append((chunk_start, len(raw)))

    # Row-pack all constant matrices into one lane-dense (rows, 128) array; every matrix
    # starts on a 16-row boundary so bf16 DMA chunks and in-kernel slices are tile-aligned.
    offsets, packed, cur = [], [], 0
    for mm in raw:
        r, ccols = mm.shape
        rp = _round_up(r, 16)
        buf = np.zeros((rp, LANE), np.float32)
        buf[:r, :ccols] = mm
        packed.append(buf)
        offsets.append(cur)
        cur += rp
    mats = np.concatenate(packed, axis=0)

    biasmat = np.zeros((len(bias_rows), LANE), np.float32)
    for i, rrow in enumerate(bias_rows):
        biasmat[i, :rrow.shape[0]] = rrow

    ends = [offsets[i] + packed[i].shape[0] for i in range(len(raw))]
    chunks = [(offsets[a], ends[b - 1] - offsets[a]) for (a, b) in chunk_ranges]

    def as_slice(mid):
        return None if mid is None else (offsets[mid], raw[mid].shape[0], raw[mid].shape[1])

    plan = {
        "n": n,
        "layers": [{"s": as_slice(l["s"]), "m": as_slice(l["m"]), "nblk": l["nblk"],
                    "p8": l["p8"], "lout": l["lout"], "bias_row": l["bias_row"]}
                   for l in layers_plan],
        "row_pool": as_slice(row_pool_id),
        "head": (as_slice(head_id), lin_bias_row, NUM_CLASSES),
        "chunks": chunks,
        "total_rows": cur,
    }
    cost = pl.CostEstimate(
        flops=int(flops),
        transcendentals=0,
        bytes_accessed=int(mats.size * 2 + biasmat.size * 4
                           + n * h0 * _round_up(w0, LANE) * 2 + n * NUM_CLASSES * 4),
    )
    return (plan,
            jnp.asarray(mats, dtype=jnp.bfloat16),
            jnp.asarray(biasmat, dtype=jnp.float32),
            cost)


# --------------------------------------------------------------------------- #
# The single fused Pallas kernel: whole network, VMEM-resident activations,
# constants streamed from HBM per layer and overlapped with compute.
# --------------------------------------------------------------------------- #
def fused_net_kernel(x_ref, bias_ref, mats_hbm, out_ref, mats_vmem, copy_sem, *, plan):
    chunks = plan["chunks"]
    num_chunks = len(chunks)

    def start_chunk(ci):
        r0, nr = chunks[ci]
        pltpu.make_async_copy(mats_hbm.at[pl.ds(r0, nr), :],
                              mats_vmem.at[pl.ds(r0, nr), :],
                              copy_sem.at[ci]).start()

    def wait_chunk(ci):
        r0, nr = chunks[ci]
        pltpu.make_async_copy(mats_hbm.at[pl.ds(r0, nr), :],
                              mats_vmem.at[pl.ds(r0, nr), :],
                              copy_sem.at[ci]).wait()

    def mat(sl):
        off, r, ccols = sl
        return mats_vmem[off:off + r, :ccols]         # static, tile-aligned VMEM slice (bf16)

    LOOKAHEAD = 2
    for ci in range(min(LOOKAHEAD, num_chunks)):      # prime the weight-streaming pipeline
        start_chunk(ci)
    wait_chunk(0)

    a = x_ref[...]                                    # (N*H0, 128) bf16; lanes = (col, chan)
    for k, layer in enumerate(plan["layers"]):
        if k + LOOKAHEAD < num_chunks:
            start_chunk(k + LOOKAHEAD)                # prefetch layer k+2 while computing k

        m = mat(layer["m"])
        if layer["s"] is None:                        # 1x1-spatial layer: center-tap GEMM
            y = jnp.dot(a, m, preferred_element_type=jnp.float32)
        else:
            # One stacked row-selection dot, lane-concat of the kh blocks (128-aligned),
            # then one K-stacked weight dot: 2 MXU ops per conv layer.
            sa = jnp.dot(mat(layer["s"]), a, preferred_element_type=jnp.float32)
            p8, nblk = layer["p8"], layer["nblk"]
            if nblk > 1:
                sa = jnp.concatenate(
                    [sa[t * p8:(t + 1) * p8, :] for t in range(nblk)], axis=1)
            y = jnp.dot(sa.astype(jnp.bfloat16), m, preferred_element_type=jnp.float32)

        r0 = layer["bias_row"]
        b = bias_ref[r0:r0 + 1, :layer["lout"]]
        a = jnp.maximum(y + b, 0.0).astype(jnp.bfloat16)   # fused (BN+conv) bias + ReLU

        if k + 1 < num_chunks:                        # next layer's (or head's) weights
            wait_chunk(k + 1)

    if plan["row_pool"] is not None:                  # only when the final spatial H > 1
        a = jnp.dot(mat(plan["row_pool"]), a,
                    preferred_element_type=jnp.float32).astype(jnp.bfloat16)
    elif a.shape[0] != plan["n"]:
        a = a[:plan["n"], :]                          # drop carried padding rows
    head_sl, hb_row, ncls = plan["head"]
    logits = jnp.dot(a, mat(head_sl), preferred_element_type=jnp.float32)
    out_ref[...] = logits + bias_ref[hb_row:hb_row + 1, :ncls]


def make_audio_classifier(params, input_shape):
    n, cin, h0, w0 = input_shape
    assert cin == 1, "AudioClassifier takes single-channel spectrograms"
    plan, mats, biasmat, cost = build_fused_network(params, n, h0, w0)
    l0 = _round_up(w0, LANE)

    fwd = pl.pallas_call(
        functools.partial(fused_net_kernel, plan=plan),
        out_shape=jax.ShapeDtypeStruct((n, NUM_CLASSES), jnp.float32),
        in_specs=[pl.BlockSpec(memory_space=pltpu.MemorySpace.VMEM),   # x (small, auto-copied)
                  pl.BlockSpec(memory_space=pltpu.MemorySpace.VMEM),   # bias rows (tiny)
                  pl.BlockSpec(memory_space=pl.ANY)],                  # packed weights, manual DMA
        scratch_shapes=[pltpu.VMEM((plan["total_rows"], LANE), jnp.bfloat16),
                        pltpu.SemaphoreType.DMA((len(plan["chunks"]),))],
        compiler_params=pltpu.CompilerParams(vmem_limit_bytes=32 * 1024 * 1024),
        cost_estimate=cost,
    )

    @jax.jit
    def forward(x, mats_arg, bias_arg):
        # NCHW (N, 1, H, W) -> lane-dense 2D activation in bf16, lane-padded to 128.
        x2d = x.reshape(n * h0, w0).astype(jnp.bfloat16)
        if l0 > w0:
            x2d = jnp.pad(x2d, ((0, 0), (0, l0 - w0)))
        return fwd(x2d, bias_arg, mats_arg)

    def apply(x):
        assert tuple(x.shape) == (n, cin, h0, w0), (
            f"forward was built for input shape {(n, cin, h0, w0)}, got {x.shape}")
        return forward(x, mats, biasmat)

    return apply


# --------------------------------------------------------------------------- #
# Pure-JAX reference (same eval-mode BN folding) for a numerical self-check.
# --------------------------------------------------------------------------- #
def reference_forward(params, x):
    y = x.astype(jnp.float32)
    for (w, scale, bias) in params["conv"]:
        y = jax.lax.conv_general_dilated(
            y, w, window_strides=(2, 2), padding=((1, 1), (1, 1)),
            dimension_numbers=("NCHW", "OIHW", "NCHW"),
            precision=jax.lax.Precision.HIGHEST)
        y = y * scale[None, :, None, None] + bias[None, :, None, None]
        y = jnp.maximum(y, 0.0)
    y = jnp.mean(y, axis=(2, 3))
    return jnp.dot(y, params["lin_w"].T, precision=jax.lax.Precision.HIGHEST) + params["lin_b"]


if __name__ == "__main__":
    key = jax.random.PRNGKey(0)
    key, pk, xk = jax.random.split(key, 3)
    params = init_params(pk)

    # Batch=2, single-channel 64x64 "spectrogram": after the 9 stride-2 convs the
    # spatial size is exactly 1x1, consistent with the module's intended usage.
    x = jax.random.normal(xk, (2, 1, 64, 64), jnp.float32)

    forward = make_audio_classifier(params, x.shape)
    logits = forward(x)
    jax.block_until_ready(logits)
    assert logits.shape == (2, NUM_CLASSES)

    ref = reference_forward(params, x)
    np.testing.assert_allclose(np.asarray(logits), np.asarray(ref), rtol=3e-2, atol=3e-2)

    print("KERNEL_OK")
</pallas_src>

<mosaic_0001>
module attributes {stable_mosaic.version = 11 : i64} {
  func.func @fused_net_kernel(%arg0: memref<128x128xbf16, #tpu.memory_space<vmem>>, %arg1: memref<10x128xf32, #tpu.memory_space<vmem>>, %arg2: memref<3040x128xbf16, #tpu.memory_space<any>>, %arg3: memref<2x20xf32, #tpu.memory_space<vmem>>, %arg4: memref<3040x128xbf16, #tpu.memory_space<vmem>>, %arg5: memref<10x!tpu.dma_semaphore, #tpu.memory_space<semaphore_mem>>) attributes {dimension_semantics = [], scalar_prefetch = 0 : i64, scratch_operands = 2 : i64, tpu.core_type = #tpu.core_type<tc>} {
    %c0_i32 = arith.constant 0 : i32
    %c0_i32_0 = arith.constant 0 : i32
    %c0_i32_1 = arith.constant 0 : i32
    %0 = tpu.memref_slice %arg2[%c0_i32_0, %c0_i32_1] : memref<3040x128xbf16, #tpu.memory_space<any>> -> memref<576x128xbf16, #tpu.memory_space<any>>
    %c0_i32_2 = arith.constant 0 : i32
    %c0_i32_3 = arith.constant 0 : i32
    %1 = tpu.memref_slice %arg4[%c0_i32_2, %c0_i32_3] : memref<3040x128xbf16, #tpu.memory_space<vmem>> -> memref<576x128xbf16, #tpu.memory_space<vmem>>
    %2 = tpu.memref_slice %arg5[%c0_i32] : memref<10x!tpu.dma_semaphore, #tpu.memory_space<semaphore_mem>> -> memref<1x!tpu.dma_semaphore, #tpu.memory_space<semaphore_mem>>
    %3 = tpu.memref_squeeze %2 : memref<1x!tpu.dma_semaphore, #tpu.memory_space<semaphore_mem>> -> memref<!tpu.dma_semaphore, #tpu.memory_space<semaphore_mem>>
    tpu.enqueue_dma source(%0 : memref<576x128xbf16, #tpu.memory_space<any>>) target(%1 : memref<576x128xbf16, #tpu.memory_space<vmem>>) target_semaphore(%3 : memref<!tpu.dma_semaphore, #tpu.memory_space<semaphore_mem>>)
    %c1_i32 = arith.constant 1 : i32
    %c576_i32 = arith.constant 576 : i32
    %c0_i32_4 = arith.constant 0 : i32
    %4 = tpu.memref_slice %arg2[%c576_i32, %c0_i32_4] : memref<3040x128xbf16, #tpu.memory_space<any>> -> memref<480x128xbf16, #tpu.memory_space<any>>
    %c576_i32_5 = arith.constant 576 : i32
    %c0_i32_6 = arith.constant 0 : i32
    %5 = tpu.memref_slice %arg4[%c576_i32_5, %c0_i32_6] : memref<3040x128xbf16, #tpu.memory_space<vmem>> -> memref<480x128xbf16, #tpu.memory_space<vmem>>
    %6 = tpu.memref_slice %arg5[%c1_i32] : memref<10x!tpu.dma_semaphore, #tpu.memory_space<semaphore_mem>> -> memref<1x!tpu.dma_semaphore, #tpu.memory_space<semaphore_mem>>
    %7 = tpu.memref_squeeze %6 : memref<1x!tpu.dma_semaphore, #tpu.memory_space<semaphore_mem>> -> memref<!tpu.dma_semaphore, #tpu.memory_space<semaphore_mem>>
    tpu.enqueue_dma source(%4 : memref<480x128xbf16, #tpu.memory_space<any>>) target(%5 : memref<480x128xbf16, #tpu.memory_space<vmem>>) target_semaphore(%7 : memref<!tpu.dma_semaphore, #tpu.memory_space<semaphore_mem>>)
    %c0_i32_7 = arith.constant 0 : i32
    %c0_i32_8 = arith.constant 0 : i32
    %c0_i32_9 = arith.constant 0 : i32
    %8 = tpu.memref_slice %arg2[%c0_i32_8, %c0_i32_9] : memref<3040x128xbf16, #tpu.memory_space<any>> -> memref<576x128xbf16, #tpu.memory_space<any>>
    %c0_i32_10 = arith.constant 0 : i32
    %c0_i32_11 = arith.constant 0 : i32
    %9 = tpu.memref_slice %arg4[%c0_i32_10, %c0_i32_11] : memref<3040x128xbf16, #tpu.memory_space<vmem>> -> memref<576x128xbf16, #tpu.memory_space<vmem>>
    %10 = tpu.memref_slice %arg5[%c0_i32_7] : memref<10x!tpu.dma_semaphore, #tpu.memory_space<semaphore_mem>> -> memref<1x!tpu.dma_semaphore, #tpu.memory_space<semaphore_mem>>
    %11 = tpu.memref_squeeze %10 : memref<1x!tpu.dma_semaphore, #tpu.memory_space<semaphore_mem>> -> memref<!tpu.dma_semaphore, #tpu.memory_space<semaphore_mem>>
    tpu.wait_dma2 semaphore(%11 : memref<!tpu.dma_semaphore, #tpu.memory_space<semaphore_mem>>) src(%8 : memref<576x128xbf16, #tpu.memory_space<any>>) dst(%9 : memref<576x128xbf16, #tpu.memory_space<vmem>>)
    %c0 = arith.constant 0 : index
    %c0_12 = arith.constant 0 : index
    %12 = vector.load %arg0[%c0, %c0_12] : memref<128x128xbf16, #tpu.memory_space<vmem>>, vector<128x128xbf16>
    %c2_i32 = arith.constant 2 : i32
    %c1056_i32 = arith.constant 1056 : i32
    %c0_i32_13 = arith.constant 0 : i32
    %13 = tpu.memref_slice %arg2[%c1056_i32, %c0_i32_13] : memref<3040x128xbf16, #tpu.memory_space<any>> -> memref<432x128xbf16, #tpu.memory_space<any>>
    %c1056_i32_14 = arith.constant 1056 : i32
    %c0_i32_15 = arith.constant 0 : i32
    %14 = tpu.memref_slice %arg4[%c1056_i32_14, %c0_i32_15] : memref<3040x128xbf16, #tpu.memory_space<vmem>> -> memref<432x128xbf16, #tpu.memory_space<vmem>>
    %15 = tpu.memref_slice %arg5[%c2_i32] : memref<10x!tpu.dma_semaphore, #tpu.memory_space<semaphore_mem>> -> memref<1x!tpu.dma_semaphore, #tpu.memory_space<semaphore_mem>>
    %16 = tpu.memref_squeeze %15 : memref<1x!tpu.dma_semaphore, #tpu.memory_space<semaphore_mem>> -> memref<!tpu.dma_semaphore, #tpu.memory_space<semaphore_mem>>
    tpu.enqueue_dma source(%13 : memref<432x128xbf16, #tpu.memory_space<any>>) target(%14 : memref<432x128xbf16, #tpu.memory_space<vmem>>) target_semaphore(%16 : memref<!tpu.dma_semaphore, #tpu.memory_space<semaphore_mem>>)
    %c192 = arith.constant 192 : index
    %c0_16 = arith.constant 0 : index
    %17 = vector.load %arg4[%c192, %c0_16] : memref<3040x128xbf16, #tpu.memory_space<vmem>>, vector<384x128xbf16>
    %c0_17 = arith.constant 0 : index
    %c0_18 = arith.constant 0 : index
    %18 = vector.load %arg4[%c0_17, %c0_18] : memref<3040x128xbf16, #tpu.memory_space<vmem>>, vector<192x128xbf16>
    %cst = arith.constant dense<0.000000e+00> : vector<192x128xf32>
    %19 = tpu.matmul %18, %12, %cst {dimension_numbers = #tpu.dot_dimension_numbers<[1], [0], [0], [1], [0, 0, 1, 1], [], []>} : vector<192x128xbf16>, vector<128x128xbf16>, vector<192x128xf32> -> vector<192x128xf32>
    %20 = vector.extract_strided_slice %19 {offsets = [0, 0], sizes = [64, 128], strides = [1, 1]} : vector<192x128xf32> to vector<64x128xf32>
    %21 = vector.extract_strided_slice %19 {offsets = [64, 0], sizes = [64, 128], strides = [1, 1]} : vector<192x128xf32> to vector<64x128xf32>
    %22 = vector.extract_strided_slice %19 {offsets = [128, 0], sizes = [64, 128], strides = [1, 1]} : vector<192x128xf32> to vector<64x128xf32>
    %23 = tpu.concatenate %20, %21, %22 in 1 : vector<64x128xf32>, vector<64x128xf32>, vector<64x128xf32> -> vector<64x384xf32>
    %24 = arith.truncf %23 : vector<64x384xf32> to vector<64x384xbf16>
    %cst_19 = arith.constant dense<0.000000e+00> : vector<64x128xf32>
    %25 = tpu.matmul %24, %17, %cst_19 {dimension_numbers = #tpu.dot_dimension_numbers<[1], [0], [0], [1], [0, 0, 1, 1], [], []>} : vector<64x384xbf16>, vector<384x128xbf16>, vector<64x128xf32> -> vector<64x128xf32>
    %c0_20 = arith.constant 0 : index
    %c0_21 = arith.constant 0 : index
    %26 = vector.load %arg1[%c0_20, %c0_21] : memref<10x128xf32, #tpu.memory_space<vmem>>, vector<1x128xf32>
    %27 = vector.broadcast %26 : vector<1x128xf32> to vector<64x128xf32>
    %28 = arith.addf %25, %27 : vector<64x128xf32>
    %cst_22 = arith.constant 0.000000e+00 : f32
    %29 = vector.broadcast %cst_22 : f32 to vector<64x128xf32>
    %30 = arith.maximumf %28, %29 : vector<64x128xf32>
    %31 = arith.truncf %30 : vector<64x128xf32> to vector<64x128xbf16>
    %c1_i32_23 = arith.constant 1 : i32
    %c576_i32_24 = arith.constant 576 : i32
    %c0_i32_25 = arith.constant 0 : i32
    %32 = tpu.memref_slice %arg2[%c576_i32_24, %c0_i32_25] : memref<3040x128xbf16, #tpu.memory_space<any>> -> memref<480x128xbf16, #tpu.memory_space<any>>
    %c576_i32_26 = arith.constant 576 : i32
    %c0_i32_27 = arith.constant 0 : i32
    %33 = tpu.memref_slice %arg4[%c576_i32_26, %c0_i32_27] : memref<3040x128xbf16, #tpu.memory_space<vmem>> -> memref<480x128xbf16, #tpu.memory_space<vmem>>
    %34 = tpu.memref_slice %arg5[%c1_i32_23] : memref<10x!tpu.dma_semaphore, #tpu.memory_space<semaphore_mem>> -> memref<1x!tpu.dma_semaphore, #tpu.memory_space<semaphore_mem>>
    %35 = tpu.memref_squeeze %34 : memref<1x!tpu.dma_semaphore, #tpu.memory_space<semaphore_mem>> -> memref<!tpu.dma_semaphore, #tpu.memory_space<semaphore_mem>>
    tpu.wait_dma2 semaphore(%35 : memref<!tpu.dma_semaphore, #tpu.memory_space<semaphore_mem>>) src(%32 : memref<480x128xbf16, #tpu.memory_space<any>>) dst(%33 : memref<480x128xbf16, #tpu.memory_space<vmem>>)
    %c3_i32 = arith.constant 3 : i32
    %c1488_i32 = arith.constant 1488 : i32
    %c0_i32_28 = arith.constant 0 : i32
    %36 = tpu.memref_slice %arg2[%c1488_i32, %c0_i32_28] : memref<3040x128xbf16, #tpu.memory_space<any>> -> memref<416x128xbf16, #tpu.memory_space<any>>
    %c1488_i32_29 = arith.constant 1488 : i32
    %c0_i32_30 = arith.constant 0 : i32
    %37 = tpu.memref_slice %arg4[%c1488_i32_29, %c0_i32_30] : memref<3040x128xbf16, #tpu.memory_space<vmem>> -> memref<416x128xbf16, #tpu.memory_space<vmem>>
    %38 = tpu.memref_slice %arg5[%c3_i32] : memref<10x!tpu.dma_semaphore, #tpu.memory_space<semaphore_mem>> -> memref<1x!tpu.dma_semaphore, #tpu.memory_space<semaphore_mem>>
    %39 = tpu.memref_squeeze %38 : memref<1x!tpu.dma_semaphore, #tpu.memory_space<semaphore_mem>> -> memref<!tpu.dma_semaphore, #tpu.memory_space<semaphore_mem>>
    tpu.enqueue_dma source(%36 : memref<416x128xbf16, #tpu.memory_space<any>>) target(%37 : memref<416x128xbf16, #tpu.memory_space<vmem>>) target_semaphore(%39 : memref<!tpu.dma_semaphore, #tpu.memory_space<semaphore_mem>>)
    %c672 = arith.constant 672 : index
    %c0_31 = arith.constant 0 : index
    %40 = vector.load %arg4[%c672, %c0_31] : memref<3040x128xbf16, #tpu.memory_space<vmem>>, vector<384x128xbf16>
    %c576 = arith.constant 576 : index
    %c0_32 = arith.constant 0 : index
    %41 = vector.load %arg4[%c576, %c0_32] : memref<3040x128xbf16, #tpu.memory_space<vmem>>, vector<96x64xbf16>
    %cst_33 = arith.constant dense<0.000000e+00> : vector<96x128xf32>
    %42 = tpu.matmul %41, %31, %cst_33 {dimension_numbers = #tpu.dot_dimension_numbers<[1], [0], [0], [1], [0, 0, 1, 1], [], []>} : vector<96x64xbf16>, vector<64x128xbf16>, vector<96x128xf32> -> vector<96x128xf32>
    %43 = vector.extract_strided_slice %42 {offsets = [0, 0], sizes = [32, 128], strides = [1, 1]} : vector<96x128xf32> to vector<32x128xf32>
    %44 = vector.extract_strided_slice %42 {offsets = [32, 0], sizes = [32, 128], strides = [1, 1]} : vector<96x128xf32> to vector<32x128xf32>
    %45 = vector.extract_strided_slice %42 {offsets = [64, 0], sizes = [32, 128], strides = [1, 1]} : vector<96x128xf32> to vector<32x128xf32>
    %46 = tpu.concatenate %43, %44, %45 in 1 : vector<32x128xf32>, vector<32x128xf32>, vector<32x128xf32> -> vector<32x384xf32>
    %47 = arith.truncf %46 : vector<32x384xf32> to vector<32x384xbf16>
    %cst_34 = arith.constant dense<0.000000e+00> : vector<32x128xf32>
    %48 = tpu.matmul %47, %40, %cst_34 {dimension_numbers = #tpu.dot_dimension_numbers<[1], [0], [0], [1], [0, 0, 1, 1], [], []>} : vector<32x384xbf16>, vector<384x128xbf16>, vector<32x128xf32> -> vector<32x128xf32>
    %c1 = arith.constant 1 : index
    %c0_35 = arith.constant 0 : index
    %49 = vector.load %arg1[%c1, %c0_35] : memref<10x128xf32, #tpu.memory_space<vmem>>, vector<1x128xf32>
    %50 = vector.broadcast %49 : vector<1x128xf32> to vector<32x128xf32>
    %51 = arith.addf %48, %50 : vector<32x128xf32>
    %cst_36 = arith.constant 0.000000e+00 : f32
    %52 = vector.broadcast %cst_36 : f32 to vector<32x128xf32>
    %53 = arith.maximumf %51, %52 : vector<32x128xf32>
    %54 = arith.truncf %53 : vector<32x128xf32> to vector<32x128xbf16>
    %c2_i32_37 = arith.constant 2 : i32
    %c1056_i32_38 = arith.constant 1056 : i32
    %c0_i32_39 = arith.constant 0 : i32
    %55 = tpu.memref_slice %arg2[%c1056_i32_38, %c0_i32_39] : memref<3040x128xbf16, #tpu.memory_space<any>> -> memref<432x128xbf16, #tpu.memory_space<any>>
    %c1056_i32_40 = arith.constant 1056 : i32
    %c0_i32_41 = arith.constant 0 : i32
    %56 = tpu.memref_slice %arg4[%c1056_i32_40, %c0_i32_41] : memref<3040x128xbf16, #tpu.memory_space<vmem>> -> memref<432x128xbf16, #tpu.memory_space<vmem>>
    %57 = tpu.memref_slice %arg5[%c2_i32_37] : memref<10x!tpu.dma_semaphore, #tpu.memory_space<semaphore_mem>> -> memref<1x!tpu.dma_semaphore, #tpu.memory_space<semaphore_mem>>
    %58 = tpu.memref_squeeze %57 : memref<1x!tpu.dma_semaphore, #tpu.memory_space<semaphore_mem>> -> memref<!tpu.dma_semaphore, #tpu.memory_space<semaphore_mem>>
    tpu.wait_dma2 semaphore(%58 : memref<!tpu.dma_semaphore, #tpu.memory_space<semaphore_mem>>) src(%55 : memref<432x128xbf16, #tpu.memory_space<any>>) dst(%56 : memref<432x128xbf16, #tpu.memory_space<vmem>>)
    %c4_i32 = arith.constant 4 : i32
    %c1904_i32 = arith.constant 1904 : i32
    %c0_i32_42 = arith.constant 0 : i32
    %59 = tpu.memref_slice %arg2[%c1904_i32, %c0_i32_42] : memref<3040x128xbf16, #tpu.memory_space<any>> -> memref<416x128xbf16, #tpu.memory_space<any>>
    %c1904_i32_43 = arith.constant 1904 : i32
    %c0_i32_44 = arith.constant 0 : i32
    %60 = tpu.memref_slice %arg4[%c1904_i32_43, %c0_i32_44] : memref<3040x128xbf16, #tpu.memory_space<vmem>> -> memref<416x128xbf16, #tpu.memory_space<vmem>>
    %61 = tpu.memref_slice %arg5[%c4_i32] : memref<10x!tpu.dma_semaphore, #tpu.memory_space<semaphore_mem>> -> memref<1x!tpu.dma_semaphore, #tpu.memory_space<semaphore_mem>>
    %62 = tpu.memref_squeeze %61 : memref<1x!tpu.dma_semaphore, #tpu.memory_space<semaphore_mem>> -> memref<!tpu.dma_semaphore, #tpu.memory_space<semaphore_mem>>
    tpu.enqueue_dma source(%59 : memref<416x128xbf16, #tpu.memory_space<any>>) target(%60 : memref<416x128xbf16, #tpu.memory_space<vmem>>) target_semaphore(%62 : memref<!tpu.dma_semaphore, #tpu.memory_space<semaphore_mem>>)
    %c1104 = arith.constant 1104 : index
    %c0_45 = arith.constant 0 : index
    %63 = vector.load %arg4[%c1104, %c0_45] : memref<3040x128xbf16, #tpu.memory_space<vmem>>, vector<384x128xbf16>
    %c1056 = arith.constant 1056 : index
    %c0_46 = arith.constant 0 : index
    %64 = vector.load %arg4[%c1056, %c0_46] : memref<3040x128xbf16, #tpu.memory_space<vmem>>, vector<48x32xbf16>
    %cst_47 = arith.constant dense<0.000000e+00> : vector<48x128xf32>
    %65 = tpu.matmul %64, %54, %cst_47 {dimension_numbers = #tpu.dot_dimension_numbers<[1], [0], [0], [1], [0, 0, 1, 1], [], []>} : vector<48x32xbf16>, vector<32x128xbf16>, vector<48x128xf32> -> vector<48x128xf32>
    %66 = vector.extract_strided_slice %65 {offsets = [0, 0], sizes = [16, 128], strides = [1, 1]} : vector<48x128xf32> to vector<16x128xf32>
    %67 = vector.extract_strided_slice %65 {offsets = [16, 0], sizes = [16, 128], strides = [1, 1]} : vector<48x128xf32> to vector<16x128xf32>
    %68 = vector.extract_strided_slice %65 {offsets = [32, 0], sizes = [16, 128], strides = [1, 1]} : vector<48x128xf32> to vector<16x128xf32>
    %69 = tpu.concatenate %66, %67, %68 in 1 : vector<16x128xf32>, vector<16x128xf32>, vector<16x128xf32> -> vector<16x384xf32>
    %70 = arith.truncf %69 : vector<16x384xf32> to vector<16x384xbf16>
    %cst_48 = arith.constant dense<0.000000e+00> : vector<16x128xf32>
    %71 = tpu.matmul %70, %63, %cst_48 {dimension_numbers = #tpu.dot_dimension_numbers<[1], [0], [0], [1], [0, 0, 1, 1], [], []>} : vector<16x384xbf16>, vector<384x128xbf16>, vector<16x128xf32> -> vector<16x128xf32>
    %c2 = arith.constant 2 : index
    %c0_49 = arith.constant 0 : index
    %72 = vector.load %arg1[%c2, %c0_49] : memref<10x128xf32, #tpu.memory_space<vmem>>, vector<1x128xf32>
    %73 = vector.broadcast %72 : vector<1x128xf32> to vector<16x128xf32>
    %74 = arith.addf %71, %73 : vector<16x128xf32>
    %cst_50 = arith.constant 0.000000e+00 : f32
    %75 = vector.broadcast %cst_50 : f32 to vector<16x128xf32>
    %76 = arith.maximumf %74, %75 : vector<16x128xf32>
    %77 = arith.truncf %76 : vector<16x128xf32> to vector<16x128xbf16>
    %c3_i32_51 = arith.constant 3 : i32
    %c1488_i32_52 = arith.constant 1488 : i32
    %c0_i32_53 = arith.constant 0 : i32
    %78 = tpu.memref_slice %arg2[%c1488_i32_52, %c0_i32_53] : memref<3040x128xbf16, #tpu.memory_space<any>> -> memref<416x128xbf16, #tpu.memory_space<any>>
    %c1488_i32_54 = arith.constant 1488 : i32
    %c0_i32_55 = arith.constant 0 : i32
    %79 = tpu.memref_slice %arg4[%c1488_i32_54, %c0_i32_55] : memref<3040x128xbf16, #tpu.memory_space<vmem>> -> memref<416x128xbf16, #tpu.memory_space<vmem>>
    %80 = tpu.memref_slice %arg5[%c3_i32_51] : memref<10x!tpu.dma_semaphore, #tpu.memory_space<semaphore_mem>> -> memref<1x!tpu.dma_semaphore, #tpu.memory_space<semaphore_mem>>
    %81 = tpu.memref_squeeze %80 : memref<1x!tpu.dma_semaphore, #tpu.memory_space<semaphore_mem>> -> memref<!tpu.dma_semaphore, #tpu.memory_space<semaphore_mem>>
    tpu.wait_dma2 semaphore(%81 : memref<!tpu.dma_semaphore, #tpu.memory_space<semaphore_mem>>) src(%78 : memref<416x128xbf16, #tpu.memory_space<any>>) dst(%79 : memref<416x128xbf16, #tpu.memory_space<vmem>>)
    %c5_i32 = arith.constant 5 : i32
    %c2320_i32 = arith.constant 2320 : i32
    %c0_i32_56 = arith.constant 0 : i32
    %82 = tpu.memref_slice %arg2[%c2320_i32, %c0_i32_56] : memref<3040x128xbf16, #tpu.memory_space<any>> -> memref<272x128xbf16, #tpu.memory_space<any>>
    %c2320_i32_57 = arith.constant 2320 : i32
    %c0_i32_58 = arith.constant 0 : i32
    %83 = tpu.memref_slice %arg4[%c2320_i32_57, %c0_i32_58] : memref<3040x128xbf16, #tpu.memory_space<vmem>> -> memref<272x128xbf16, #tpu.memory_space<vmem>>
    %84 = tpu.memref_slice %arg5[%c5_i32] : memref<10x!tpu.dma_semaphore, #tpu.memory_space<semaphore_mem>> -> memref<1x!tpu.dma_semaphore, #tpu.memory_space<semaphore_mem>>
    %85 = tpu.memref_squeeze %84 : memref<1x!tpu.dma_semaphore, #tpu.memory_space<semaphore_mem>> -> memref<!tpu.dma_semaphore, #tpu.memory_space<semaphore_mem>>
    tpu.enqueue_dma source(%82 : memref<272x128xbf16, #tpu.memory_space<any>>) target(%83 : memref<272x128xbf16, #tpu.memory_space<vmem>>) target_semaphore(%85 : memref<!tpu.dma_semaphore, #tpu.memory_space<semaphore_mem>>)
    %c1520 = arith.constant 1520 : index
    %c0_59 = arith.constant 0 : index
    %86 = vector.load %arg4[%c1520, %c0_59] : memref<3040x128xbf16, #tpu.memory_space<vmem>>, vector<384x128xbf16>
    %c1488 = arith.constant 1488 : index
    %c0_60 = arith.constant 0 : index
    %87 = vector.load %arg4[%c1488, %c0_60] : memref<3040x128xbf16, #tpu.memory_space<vmem>>, vector<24x16xbf16>
    %cst_61 = arith.constant dense<0.000000e+00> : vector<24x128xf32>
    %88 = tpu.matmul %87, %77, %cst_61 {dimension_numbers = #tpu.dot_dimension_numbers<[1], [0], [0], [1], [0, 0, 1, 1], [], []>} : vector<24x16xbf16>, vector<16x128xbf16>, vector<24x128xf32> -> vector<24x128xf32>
    %89 = vector.extract_strided_slice %88 {offsets = [0, 0], sizes = [8, 128], strides = [1, 1]} : vector<24x128xf32> to vector<8x128xf32>
    %90 = vector.extract_strided_slice %88 {offsets = [8, 0], sizes = [8, 128], strides = [1, 1]} : vector<24x128xf32> to vector<8x128xf32>
    %91 = vector.extract_strided_slice %88 {offsets = [16, 0], sizes = [8, 128], strides = [1, 1]} : vector<24x128xf32> to vector<8x128xf32>
    %92 = tpu.concatenate %89, %90, %91 in 1 : vector<8x128xf32>, vector<8x128xf32>, vector<8x128xf32> -> vector<8x384xf32>
    %93 = arith.truncf %92 : vector<8x384xf32> to vector<8x384xbf16>
    %cst_62 = arith.constant dense<0.000000e+00> : vector<8x128xf32>
    %94 = tpu.matmul %93, %86, %cst_62 {dimension_numbers = #tpu.dot_dimension_numbers<[1], [0], [0], [1], [0, 0, 1, 1], [], []>} : vector<8x384xbf16>, vector<384x128xbf16>, vector<8x128xf32> -> vector<8x128xf32>
    %c3 = arith.constant 3 : index
    %c0_63 = arith.constant 0 : index
    %95 = vector.load %arg1[%c3, %c0_63] : memref<10x128xf32, #tpu.memory_space<vmem>>, vector<1x128xf32>
    %96 = vector.broadcast %95 : vector<1x128xf32> to vector<8x128xf32>
    %97 = arith.addf %94, %96 : vector<8x128xf32>
    %cst_64 = arith.constant 0.000000e+00 : f32
    %98 = vector.broadcast %cst_64 : f32 to vector<8x128xf32>
    %99 = arith.maximumf %97, %98 : vector<8x128xf32>
    %100 = arith.truncf %99 : vector<8x128xf32> to vector<8x128xbf16>
    %c4_i32_65 = arith.constant 4 : i32
    %c1904_i32_66 = arith.constant 1904 : i32
    %c0_i32_67 = arith.constant 0 : i32
    %101 = tpu.memref_slice %arg2[%c1904_i32_66, %c0_i32_67] : memref<3040x128xbf16, #tpu.memory_space<any>> -> memref<416x128xbf16, #tpu.memory_space<any>>
    %c1904_i32_68 = arith.constant 1904 : i32
    %c0_i32_69 = arith.constant 0 : i32
    %102 = tpu.memref_slice %arg4[%c1904_i32_68, %c0_i32_69] : memref<3040x128xbf16, #tpu.memory_space<vmem>> -> memref<416x128xbf16, #tpu.memory_space<vmem>>
    %103 = tpu.memref_slice %arg5[%c4_i32_65] : memref<10x!tpu.dma_semaphore, #tpu.memory_space<semaphore_mem>> -> memref<1x!tpu.dma_semaphore, #tpu.memory_space<semaphore_mem>>
    %104 = tpu.memref_squeeze %103 : memref<1x!tpu.dma_semaphore, #tpu.memory_space<semaphore_mem>> -> memref<!tpu.dma_semaphore, #tpu.memory_space<semaphore_mem>>
    tpu.wait_dma2 semaphore(%104 : memref<!tpu.dma_semaphore, #tpu.memory_space<semaphore_mem>>) src(%101 : memref<416x128xbf16, #tpu.memory_space<any>>) dst(%102 : memref<416x128xbf16, #tpu.memory_space<vmem>>)
    %c6_i32 = arith.constant 6 : i32
    %c2592_i32 = arith.constant 2592 : i32
    %c0_i32_70 = arith.constant 0 : i32
    %105 = tpu.memref_slice %arg2[%c2592_i32, %c0_i32_70] : memref<3040x128xbf16, #tpu.memory_space<any>> -> memref<64x128xbf16, #tpu.memory_space<any>>
    %c2592_i32_71 = arith.constant 2592 : i32
    %c0_i32_72 = arith.constant 0 : i32
    %106 = tpu.memref_slice %arg4[%c2592_i32_71, %c0_i32_72] : memref<3040x128xbf16, #tpu.memory_space<vmem>> -> memref<64x128xbf16, #tpu.memory_space<vmem>>
    %107 = tpu.memref_slice %arg5[%c6_i32] : memref<10x!tpu.dma_semaphore, #tpu.memory_space<semaphore_mem>> -> memref<1x!tpu.dma_semaphore, #tpu.memory_space<semaphore_mem>>
    %108 = tpu.memref_squeeze %107 : memref<1x!tpu.dma_semaphore, #tpu.memory_space<semaphore_mem>> -> memref<!tpu.dma_semaphore, #tpu.memory_space<semaphore_mem>>
    tpu.enqueue_dma source(%105 : memref<64x128xbf16, #tpu.memory_space<any>>) target(%106 : memref<64x128xbf16, #tpu.memory_space<vmem>>) target_semaphore(%108 : memref<!tpu.dma_semaphore, #tpu.memory_space<semaphore_mem>>)
    %c1936 = arith.constant 1936 : index
    %c0_73 = arith.constant 0 : index
    %109 = vector.load %arg4[%c1936, %c0_73] : memref<3040x128xbf16, #tpu.memory_space<vmem>>, vector<384x128xbf16>
    %c1904 = arith.constant 1904 : index
    %c0_74 = arith.constant 0 : index
    %110 = vector.load %arg4[%c1904, %c0_74] : memref<3040x128xbf16, #tpu.memory_space<vmem>>, vector<24x8xbf16>
    %cst_75 = arith.constant dense<0.000000e+00> : vector<24x128xf32>
    %111 = tpu.matmul %110, %100, %cst_75 {dimension_numbers = #tpu.dot_dimension_numbers<[1], [0], [0], [1], [0, 0, 1, 1], [], []>} : vector<24x8xbf16>, vector<8x128xbf16>, vector<24x128xf32> -> vector<24x128xf32>
    %112 = vector.extract_strided_slice %111 {offsets = [0, 0], sizes = [8, 128], strides = [1, 1]} : vector<24x128xf32> to vector<8x128xf32>
    %113 = vector.extract_strided_slice %111 {offsets = [8, 0], sizes = [8, 128], strides = [1, 1]} : vector<24x128xf32> to vector<8x128xf32>
    %114 = vector.extract_strided_slice %111 {offsets = [16, 0], sizes = [8, 128], strides = [1, 1]} : vector<24x128xf32> to vector<8x128xf32>
    %115 = tpu.concatenate %112, %113, %114 in 1 : vector<8x128xf32>, vector<8x128xf32>, vector<8x128xf32> -> vector<8x384xf32>
    %116 = arith.truncf %115 : vector<8x384xf32> to vector<8x384xbf16>
    %cst_76 = arith.constant dense<0.000000e+00> : vector<8x128xf32>
    %117 = tpu.matmul %116, %109, %cst_76 {dimension_numbers = #tpu.dot_dimension_numbers<[1], [0], [0], [1], [0, 0, 1, 1], [], []>} : vector<8x384xbf16>, vector<384x128xbf16>, vector<8x128xf32> -> vector<8x128xf32>
    %c4 = arith.constant 4 : index
    %c0_77 = arith.constant 0 : index
    %118 = vector.load %arg1[%c4, %c0_77] : memref<10x128xf32, #tpu.memory_space<vmem>>, vector<1x128xf32>
    %119 = vector.broadcast %118 : vector<1x128xf32> to vector<8x128xf32>
    %120 = arith.addf %117, %119 : vector<8x128xf32>
    %cst_78 = arith.constant 0.000000e+00 : f32
    %121 = vector.broadcast %cst_78 : f32 to vector<8x128xf32>
    %122 = arith.maximumf %120, %121 : vector<8x128xf32>
    %123 = arith.truncf %122 : vector<8x128xf32> to vector<8x128xbf16>
    %c5_i32_79 = arith.constant 5 : i32
    %c2320_i32_80 = arith.constant 2320 : i32
    %c0_i32_81 = arith.constant 0 : i32
    %124 = tpu.memref_slice %arg2[%c2320_i32_80, %c0_i32_81] : memref<3040x128xbf16, #tpu.memory_space<any>> -> memref<272x128xbf16, #tpu.memory_space<any>>
    %c2320_i32_82 = arith.constant 2320 : i32
    %c0_i32_83 = arith.constant 0 : i32
    %125 = tpu.memref_slice %arg4[%c2320_i32_82, %c0_i32_83] : memref<3040x128xbf16, #tpu.memory_space<vmem>> -> memref<272x128xbf16, #tpu.memory_space<vmem>>
    %126 = tpu.memref_slice %arg5[%c5_i32_79] : memref<10x!tpu.dma_semaphore, #tpu.memory_space<semaphore_mem>> -> memref<1x!tpu.dma_semaphore, #tpu.memory_space<semaphore_mem>>
    %127 = tpu.memref_squeeze %126 : memref<1x!tpu.dma_semaphore, #tpu.memory_space<semaphore_mem>> -> memref<!tpu.dma_semaphore, #tpu.memory_space<semaphore_mem>>
    tpu.wait_dma2 semaphore(%127 : memref<!tpu.dma_semaphore, #tpu.memory_space<semaphore_mem>>) src(%124 : memref<272x128xbf16, #tpu.memory_space<any>>) dst(%125 : memref<272x128xbf16, #tpu.memory_space<vmem>>)
    %c7_i32 = arith.constant 7 : i32
    %c2656_i32 = arith.constant 2656 : i32
    %c0_i32_84 = arith.constant 0 : i32
    %128 = tpu.memref_slice %arg2[%c2656_i32, %c0_i32_84] : memref<3040x128xbf16, #tpu.memory_space<any>> -> memref<128x128xbf16, #tpu.memory_space<any>>
    %c2656_i32_85 = arith.constant 2656 : i32
    %c0_i32_86 = arith.constant 0 : i32
    %129 = tpu.memref_slice %arg4[%c2656_i32_85, %c0_i32_86] : memref<3040x128xbf16, #tpu.memory_space<vmem>> -> memref<128x128xbf16, #tpu.memory_space<vmem>>
    %130 = tpu.memref_slice %arg5[%c7_i32] : memref<10x!tpu.dma_semaphore, #tpu.memory_space<semaphore_mem>> -> memref<1x!tpu.dma_semaphore, #tpu.memory_space<semaphore_mem>>
    %131 = tpu.memref_squeeze %130 : memref<1x!tpu.dma_semaphore, #tpu.memory_space<semaphore_mem>> -> memref<!tpu.dma_semaphore, #tpu.memory_space<semaphore_mem>>
    tpu.enqueue_dma source(%128 : memref<128x128xbf16, #tpu.memory_space<any>>) target(%129 : memref<128x128xbf16, #tpu.memory_space<vmem>>) target_semaphore(%131 : memref<!tpu.dma_semaphore, #tpu.memory_space<semaphore_mem>>)
    %c2336 = arith.constant 2336 : index
    %c0_87 = arith.constant 0 : index
    %132 = vector.load %arg4[%c2336, %c0_87] : memref<3040x128xbf16, #tpu.memory_space<vmem>>, vector<256x64xbf16>
    %c2320 = arith.constant 2320 : index
    %c0_88 = arith.constant 0 : index
    %133 = vector.load %arg4[%c2320, %c0_88] : memref<3040x128xbf16, #tpu.memory_space<vmem>>, vector<16x8xbf16>
    %cst_89 = arith.constant dense<0.000000e+00> : vector<16x128xf32>
    %134 = tpu.matmul %133, %123, %cst_89 {dimension_numbers = #tpu.dot_dimension_numbers<[1], [0], [0], [1], [0, 0, 1, 1], [], []>} : vector<16x8xbf16>, vector<8x128xbf16>, vector<16x128xf32> -> vector<16x128xf32>
    %135 = vector.extract_strided_slice %134 {offsets = [0, 0], sizes = [8, 128], strides = [1, 1]} : vector<16x128xf32> to vector<8x128xf32>
    %136 = vector.extract_strided_slice %134 {offsets = [8, 0], sizes = [8, 128], strides = [1, 1]} : vector<16x128xf32> to vector<8x128xf32>
    %137 = tpu.concatenate %135, %136 in 1 : vector<8x128xf32>, vector<8x128xf32> -> vector<8x256xf32>
    %138 = arith.truncf %137 : vector<8x256xf32> to vector<8x256xbf16>
    %cst_90 = arith.constant dense<0.000000e+00> : vector<8x64xf32>
    %139 = tpu.matmul %138, %132, %cst_90 {dimension_numbers = #tpu.dot_dimension_numbers<[1], [0], [0], [1], [0, 0, 1, 1], [], []>} : vector<8x256xbf16>, vector<256x64xbf16>, vector<8x64xf32> -> vector<8x64xf32>
    %c5 = arith.constant 5 : index
    %c0_91 = arith.constant 0 : index
    %140 = vector.load %arg1[%c5, %c0_91] : memref<10x128xf32, #tpu.memory_space<vmem>>, vector<1x64xf32>
    %141 = vector.broadcast %140 : vector<1x64xf32> to vector<8x64xf32>
    %142 = arith.addf %139, %141 : vector<8x64xf32>
    %cst_92 = arith.constant 0.000000e+00 : f32
    %143 = vector.broadcast %cst_92 : f32 to vector<8x64xf32>
    %144 = arith.maximumf %142, %143 : vector<8x64xf32>
    %145 = arith.truncf %144 : vector<8x64xf32> to vector<8x64xbf16>
    %c6_i32_93 = arith.constant 6 : i32
    %c2592_i32_94 = arith.constant 2592 : i32
    %c0_i32_95 = arith.constant 0 : i32
    %146 = tpu.memref_slice %arg2[%c2592_i32_94, %c0_i32_95] : memref<3040x128xbf16, #tpu.memory_space<any>> -> memref<64x128xbf16, #tpu.memory_space<any>>
    %c2592_i32_96 = arith.constant 2592 : i32
    %c0_i32_97 = arith.constant 0 : i32
    %147 = tpu.memref_slice %arg4[%c2592_i32_96, %c0_i32_97] : memref<3040x128xbf16, #tpu.memory_space<vmem>> -> memref<64x128xbf16, #tpu.memory_space<vmem>>
    %148 = tpu.memref_slice %arg5[%c6_i32_93] : memref<10x!tpu.dma_semaphore, #tpu.memory_space<semaphore_mem>> -> memref<1x!tpu.dma_semaphore, #tpu.memory_space<semaphore_mem>>
    %149 = tpu.memref_squeeze %148 : memref<1x!tpu.dma_semaphore, #tpu.memory_space<semaphore_mem>> -> memref<!tpu.dma_semaphore, #tpu.memory_space<semaphore_mem>>
    tpu.wait_dma2 semaphore(%149 : memref<!tpu.dma_semaphore, #tpu.memory_space<semaphore_mem>>) src(%146 : memref<64x128xbf16, #tpu.memory_space<any>>) dst(%147 : memref<64x128xbf16, #tpu.memory_space<vmem>>)
    %c8_i32 = arith.constant 8 : i32
    %c2784_i32 = arith.constant 2784 : i32
    %c0_i32_98 = arith.constant 0 : i32
    %150 = tpu.memref_slice %arg2[%c2784_i32, %c0_i32_98] : memref<3040x128xbf16, #tpu.memory_space<any>> -> memref<128x128xbf16, #tpu.memory_space<any>>
    %c2784_i32_99 = arith.constant 2784 : i32
    %c0_i32_100 = arith.constant 0 : i32
    %151 = tpu.memref_slice %arg4[%c2784_i32_99, %c0_i32_100] : memref<3040x128xbf16, #tpu.memory_space<vmem>> -> memref<128x128xbf16, #tpu.memory_space<vmem>>
    %152 = tpu.memref_slice %arg5[%c8_i32] : memref<10x!tpu.dma_semaphore, #tpu.memory_space<semaphore_mem>> -> memref<1x!tpu.dma_semaphore, #tpu.memory_space<semaphore_mem>>
    %153 = tpu.memref_squeeze %152 : memref<1x!tpu.dma_semaphore, #tpu.memory_space<semaphore_mem>> -> memref<!tpu.dma_semaphore, #tpu.memory_space<semaphore_mem>>
    tpu.enqueue_dma source(%150 : memref<128x128xbf16, #tpu.memory_space<any>>) target(%151 : memref<128x128xbf16, #tpu.memory_space<vmem>>) target_semaphore(%153 : memref<!tpu.dma_semaphore, #tpu.memory_space<semaphore_mem>>)
    %c2592 = arith.constant 2592 : index
    %c0_101 = arith.constant 0 : index
    %154 = vector.load %arg4[%c2592, %c0_101] : memref<3040x128xbf16, #tpu.memory_space<vmem>>, vector<64x128xbf16>
    %cst_102 = arith.constant dense<0.000000e+00> : vector<8x128xf32>
    %155 = tpu.matmul %145, %154, %cst_102 {dimension_numbers = #tpu.dot_dimension_numbers<[1], [0], [0], [1], [0, 0, 1, 1], [], []>} : vector<8x64xbf16>, vector<64x128xbf16>, vector<8x128xf32> -> vector<8x128xf32>
    %c6 = arith.constant 6 : index
    %c0_103 = arith.constant 0 : index
    %156 = vector.load %arg1[%c6, %c0_103] : memref<10x128xf32, #tpu.memory_space<vmem>>, vector<1x128xf32>
    %157 = vector.broadcast %156 : vector<1x128xf32> to vector<8x128xf32>
    %158 = arith.addf %155, %157 : vector<8x128xf32>
    %cst_104 = arith.constant 0.000000e+00 : f32
    %159 = vector.broadcast %cst_104 : f32 to vector<8x128xf32>
    %160 = arith.maximumf %158, %159 : vector<8x128xf32>
    %161 = arith.truncf %160 : vector<8x128xf32> to vector<8x128xbf16>
    %c7_i32_105 = arith.constant 7 : i32
    %c2656_i32_106 = arith.constant 2656 : i32
    %c0_i32_107 = arith.constant 0 : i32
    %162 = tpu.memref_slice %arg2[%c2656_i32_106, %c0_i32_107] : memref<3040x128xbf16, #tpu.memory_space<any>> -> memref<128x128xbf16, #tpu.memory_space<any>>
    %c2656_i32_108 = arith.constant 2656 : i32
    %c0_i32_109 = arith.constant 0 : i32
    %163 = tpu.memref_slice %arg4[%c2656_i32_108, %c0_i32_109] : memref<3040x128xbf16, #tpu.memory_space<vmem>> -> memref<128x128xbf16, #tpu.memory_space<vmem>>
    %164 = tpu.memref_slice %arg5[%c7_i32_105] : memref<10x!tpu.dma_semaphore, #tpu.memory_space<semaphore_mem>> -> memref<1x!tpu.dma_semaphore, #tpu.memory_space<semaphore_mem>>
    %165 = tpu.memref_squeeze %164 : memref<1x!tpu.dma_semaphore, #tpu.memory_space<semaphore_mem>> -> memref<!tpu.dma_semaphore, #tpu.memory_space<semaphore_mem>>
    tpu.wait_dma2 semaphore(%165 : memref<!tpu.dma_semaphore, #tpu.memory_space<semaphore_mem>>) src(%162 : memref<128x128xbf16, #tpu.memory_space<any>>) dst(%163 : memref<128x128xbf16, #tpu.memory_space<vmem>>)
    %c9_i32 = arith.constant 9 : i32
    %c2912_i32 = arith.constant 2912 : i32
    %c0_i32_110 = arith.constant 0 : i32
    %166 = tpu.memref_slice %arg2[%c2912_i32, %c0_i32_110] : memref<3040x128xbf16, #tpu.memory_space<any>> -> memref<128x128xbf16, #tpu.memory_space<any>>
    %c2912_i32_111 = arith.constant 2912 : i32
    %c0_i32_112 = arith.constant 0 : i32
    %167 = tpu.memref_slice %arg4[%c2912_i32_111, %c0_i32_112] : memref<3040x128xbf16, #tpu.memory_space<vmem>> -> memref<128x128xbf16, #tpu.memory_space<vmem>>
    %168 = tpu.memref_slice %arg5[%c9_i32] : memref<10x!tpu.dma_semaphore, #tpu.memory_space<semaphore_mem>> -> memref<1x!tpu.dma_semaphore, #tpu.memory_space<semaphore_mem>>
    %169 = tpu.memref_squeeze %168 : memref<1x!tpu.dma_semaphore, #tpu.memory_space<semaphore_mem>> -> memref<!tpu.dma_semaphore, #tpu.memory_space<semaphore_mem>>
    tpu.enqueue_dma source(%166 : memref<128x128xbf16, #tpu.memory_space<any>>) target(%167 : memref<128x128xbf16, #tpu.memory_space<vmem>>) target_semaphore(%169 : memref<!tpu.dma_semaphore, #tpu.memory_space<semaphore_mem>>)
    %c2656 = arith.constant 2656 : index
    %c0_113 = arith.constant 0 : index
    %170 = vector.load %arg4[%c2656, %c0_113] : memref<3040x128xbf16, #tpu.memory_space<vmem>>, vector<128x128xbf16>
    %cst_114 = arith.constant dense<0.000000e+00> : vector<8x128xf32>
    %171 = tpu.matmul %161, %170, %cst_114 {dimension_numbers = #tpu.dot_dimension_numbers<[1], [0], [0], [1], [0, 0, 1, 1], [], []>} : vector<8x128xbf16>, vector<128x128xbf16>, vector<8x128xf32> -> vector<8x128xf32>
    %c7 = arith.constant 7 : index
    %c0_115 = arith.constant 0 : index
    %172 = vector.load %arg1[%c7, %c0_115] : memref<10x128xf32, #tpu.memory_space<vmem>>, vector<1x128xf32>
    %173 = vector.broadcast %172 : vector<1x128xf32> to vector<8x128xf32>
    %174 = arith.addf %171, %173 : vector<8x128xf32>
    %cst_116 = arith.constant 0.000000e+00 : f32
    %175 = vector.broadcast %cst_116 : f32 to vector<8x128xf32>
    %176 = arith.maximumf %174, %175 : vector<8x128xf32>
    %177 = arith.truncf %176 : vector<8x128xf32> to vector<8x128xbf16>
    %c8_i32_117 = arith.constant 8 : i32
    %c2784_i32_118 = arith.constant 2784 : i32
    %c0_i32_119 = arith.constant 0 : i32
    %178 = tpu.memref_slice %arg2[%c2784_i32_118, %c0_i32_119] : memref<3040x128xbf16, #tpu.memory_space<any>> -> memref<128x128xbf16, #tpu.memory_space<any>>
    %c2784_i32_120 = arith.constant 2784 : i32
    %c0_i32_121 = arith.constant 0 : i32
    %179 = tpu.memref_slice %arg4[%c2784_i32_120, %c0_i32_121] : memref<3040x128xbf16, #tpu.memory_space<vmem>> -> memref<128x128xbf16, #tpu.memory_space<vmem>>
    %180 = tpu.memref_slice %arg5[%c8_i32_117] : memref<10x!tpu.dma_semaphore, #tpu.memory_space<semaphore_mem>> -> memref<1x!tpu.dma_semaphore, #tpu.memory_space<semaphore_mem>>
    %181 = tpu.memref_squeeze %180 : memref<1x!tpu.dma_semaphore, #tpu.memory_space<semaphore_mem>> -> memref<!tpu.dma_semaphore, #tpu.memory_space<semaphore_mem>>
    tpu.wait_dma2 semaphore(%181 : memref<!tpu.dma_semaphore, #tpu.memory_space<semaphore_mem>>) src(%178 : memref<128x128xbf16, #tpu.memory_space<any>>) dst(%179 : memref<128x128xbf16, #tpu.memory_space<vmem>>)
    %c2784 = arith.constant 2784 : index
    %c0_122 = arith.constant 0 : index
    %182 = vector.load %arg4[%c2784, %c0_122] : memref<3040x128xbf16, #tpu.memory_space<vmem>>, vector<128x128xbf16>
    %cst_123 = arith.constant dense<0.000000e+00> : vector<8x128xf32>
    %183 = tpu.matmul %177, %182, %cst_123 {dimension_numbers = #tpu.dot_dimension_numbers<[1], [0], [0], [1], [0, 0, 1, 1], [], []>} : vector<8x128xbf16>, vector<128x128xbf16>, vector<8x128xf32> -> vector<8x128xf32>
    %c8 = arith.constant 8 : index
    %c0_124 = arith.constant 0 : index
    %184 = vector.load %arg1[%c8, %c0_124] : memref<10x128xf32, #tpu.memory_space<vmem>>, vector<1x128xf32>
    %185 = vector.broadcast %184 : vector<1x128xf32> to vector<8x128xf32>
    %186 = arith.addf %183, %185 : vector<8x128xf32>
    %cst_125 = arith.constant 0.000000e+00 : f32
    %187 = vector.broadcast %cst_125 : f32 to vector<8x128xf32>
    %188 = arith.maximumf %186, %187 : vector<8x128xf32>
    %189 = arith.truncf %188 : vector<8x128xf32> to vector<8x128xbf16>
    %c9_i32_126 = arith.constant 9 : i32
    %c2912_i32_127 = arith.constant 2912 : i32
    %c0_i32_128 = arith.constant 0 : i32
    %190 = tpu.memref_slice %arg2[%c2912_i32_127, %c0_i32_128] : memref<3040x128xbf16, #tpu.memory_space<any>> -> memref<128x128xbf16, #tpu.memory_space<any>>
    %c2912_i32_129 = arith.constant 2912 : i32
    %c0_i32_130 = arith.constant 0 : i32
    %191 = tpu.memref_slice %arg4[%c2912_i32_129, %c0_i32_130] : memref<3040x128xbf16, #tpu.memory_space<vmem>> -> memref<128x128xbf16, #tpu.memory_space<vmem>>
    %192 = tpu.memref_slice %arg5[%c9_i32_126] : memref<10x!tpu.dma_semaphore, #tpu.memory_space<semaphore_mem>> -> memref<1x!tpu.dma_semaphore, #tpu.memory_space<semaphore_mem>>
    %193 = tpu.memref_squeeze %192 : memref<1x!tpu.dma_semaphore, #tpu.memory_space<semaphore_mem>> -> memref<!tpu.dma_semaphore, #tpu.memory_space<semaphore_mem>>
    tpu.wait_dma2 semaphore(%193 : memref<!tpu.dma_semaphore, #tpu.memory_space<semaphore_mem>>) src(%190 : memref<128x128xbf16, #tpu.memory_space<any>>) dst(%191 : memref<128x128xbf16, #tpu.memory_space<vmem>>)
    %194 = vector.extract_strided_slice %189 {offsets = [0, 0], sizes = [2, 128], strides = [1, 1]} : vector<8x128xbf16> to vector<2x128xbf16>
    %c2912 = arith.constant 2912 : index
    %c0_131 = arith.constant 0 : index
    %195 = vector.load %arg4[%c2912, %c0_131] : memref<3040x128xbf16, #tpu.memory_space<vmem>>, vector<128x20xbf16>
    %cst_132 = arith.constant dense<0.000000e+00> : vector<2x20xf32>
    %196 = tpu.matmul %194, %195, %cst_132 {dimension_numbers = #tpu.dot_dimension_numbers<[1], [0], [0], [1], [0, 0, 1, 1], [], []>} : vector<2x128xbf16>, vector<128x20xbf16>, vector<2x20xf32> -> vector<2x20xf32>
    %c9 = arith.constant 9 : index
    %c0_133 = arith.constant 0 : index
    %197 = vector.load %arg1[%c9, %c0_133] : memref<10x128xf32, #tpu.memory_space<vmem>>, vector<1x20xf32>
    %198 = vector.broadcast %197 : vector<1x20xf32> to vector<2x20xf32>
    %199 = arith.addf %196, %198 : vector<2x20xf32>
    %c0_134 = arith.constant 0 : index
    %c0_135 = arith.constant 0 : index
    %200 = vector.load %arg3[%c0_134, %c0_135] : memref<2x20xf32, #tpu.memory_space<vmem>>, vector<2x20xf32>
    tpu.vector_store %arg3[%c0_134, %c0_135], %199 {strides = array<i32>} : memref<2x20xf32, #tpu.memory_space<vmem>>, vector<2x20xf32>,
    return
  }
}

</mosaic_0001>

<bundles_post_ra>
// kernel: forward.1
= control target key start
LH: loop header
LB: loop body
LE: loop exit
PB: predicated region body
PF: predicated region fallthrough
CT: control target
= control target key end

     0   :  { %8 = vsyncpa [#allocation5], 0  ;;  %s4340_s15 = smov [#allocation2]   ;;  %s4341_s17 = smov [#allocation2 + $0x120]   ;;  %s4582_s0 = inlined_call_operand.vmem [shape: bf16[128,128], index: 0, kind: input, shape index: {}]   ;;  %s4583_s1 = inlined_call_operand.vmem [shape: f32[10,128], index: 1, kind: input, shape index: {}]   ;;  %s4584_s2 = inlined_call_operand.hbm [shape: bf16[3040,128], index: 2, kind: input, shape index: {}]   ;;  %s4585_s3 = inlined_call_operand.hbm [shape: f32[2,20], index: 3, kind: output, shape index: {}]  }
   0x1   :  { %s25_s14 = scalar_lea.hbm %s4584_s2, 4608  ;;  %s21_s16 = sshll.u32 %s4340_s15, 4  ;;  %s4376_s16 = int_to_ptr.vmem [resolvable:$true] %s21_s16 }
   0x2   :  { %s35_s18 = sshll.u32 %s4341_s17, 4  ;;  %s4079_s19 = scalar_lea.vmem %s4376_s16, 4608  ;;  %s36_s18 = int_to_ptr.vmem [resolvable:$true] %s35_s18 }
   0x3   :  { %p4080_p0 = scmp.ne.s32.totalorder %s4376_s16, %s4079_s19  ;;  %s4381_s20 = scalar_lea.vmem %s4376_s16, 24320 }
   0x4   :  { %p4084_p1 = scmp.lt.s32.totalorder %s4376_s16, %s4376_s16  ;;  %p4085_p2 = scmp.lt.s32.totalorder %s4381_s20, %s4079_s19 }
   0x6   :  { %p4086_p3 = por %p4085_p2, %p4084_p1 }
   0x8   :  { %p4087_p4 = pnand %p4086_p3, %p4080_p0 }
   0xa   :  { %4090 = shalt.err (!%p4087_p4)  }
   0xb   :  { %24 = dma.hbm_to_vmem [thread:$0]  %s4584_s2, 4608, %s4376_s16, [#allocation3] }
   0xc   :  { %s4101_s23 = scalar_lea.vmem %s36_s18, 3840  ;;  %p4106_p6 = scmp.lt.s32.totalorder %s36_s18, %s4376_s16 }
   0xd   :  { %p4102_p5 = scmp.ne.s32.totalorder %s36_s18, %s4101_s23  ;;  %p4107_p7 = scmp.lt.s32.totalorder %s4381_s20, %s4101_s23 }
   0xf   :  { %p4108_p8 = por %p4107_p7, %p4106_p6 }
  0x11   :  { %p4109_p9 = pnand %p4108_p8, %p4102_p5 }
  0x13   :  { %4112 = shalt.err (!%p4109_p9)  }
  0x14   :  { %38 = dma.hbm_to_vmem [thread:$0]  %s25_s14, 3840, %s36_s18, [#allocation3 + $0x1] }
  0x15   :  { %4318 = dma.done.wait [#allocation3], 4608 }
  0x16   :  { %4319 = vsyncadd [#allocation3], 4294962688  ;;  %s59_s26 = scalar_lea.hbm %s4584_s2, 8448  ;;  %s4342_s27 = smov [#allocation2 + $0x210]  }
  0x17   :  { %s69_s28 = sshll.u32 %s4342_s27, 4  ;;  %s70_s28 = int_to_ptr.vmem [resolvable:$true] %s69_s28 }
  0x18   :  { %s4124_s29 = scalar_lea.vmem %s70_s28, 3456  ;;  %p4129_p11 = scmp.lt.s32.totalorder %s70_s28, %s4376_s16 }
  0x19   :  { %p4125_p10 = scmp.ne.s32.totalorder %s70_s28, %s4124_s29  ;;  %p4130_p12 = scmp.lt.s32.totalorder %s4381_s20, %s4124_s29 }
  0x1b   :  { %p4131_p13 = por %p4130_p12, %p4129_p11 }
  0x1d   :  { %p4132_p0 = pnand %p4131_p13, %p4125_p10 }
  0x1f   :  { %4135 = shalt.err (!%p4132_p0)  }
  0x20   :  { %72 = dma.hbm_to_vmem [thread:$0]  %s59_s26, 3456, %s70_s28, [#allocation3 + $0x2]  ;;  %v3873_v0 = vld [vmem:[%s4582_s0 + $0x38] sm:$0xff]   ;;  %v3874_v1 = vld [vmem:[%s4582_s0 + $0x30] sm:$0xff]   ;;  %v3875_v2 = vld [vmem:[%s4582_s0 + $0x28] sm:$0xff]  }
  0x21   :  { %3589 = vmatprep.subr.bf16.mxu0 %v3873_v0  ;;  %v3876_v3 = vld [vmem:[%s4582_s0 + $0x20] sm:$0xff]   ;;  %v3877_v5 = vld [vmem:[%s4582_s0 + $0x18] sm:$0xff]   ;;  %v3878_v6 = vld [vmem:[%s4582_s0 + $0x10] sm:$0xff]  }
  0x22   :  { %3590 = vmatpush3.bf16.msra.mxu0 %v3873_v0  ;;  %v3881_v4 = vld [vmem:[#allocation2] sm:$0xff]   ;;  %v3879_v7 = vld [vmem:[%s4582_s0 + $0x8] sm:$0xff]   ;;  %v3893_v8 = vld [vmem:[#allocation2 + $0xd8] sm:$0xff]  }
  0x23   :  { %3591 = vmatprep.subr.bf16.mxu0 %v3874_v1  ;;  %3605 = vmatprep.mubr.bf16.mxu0 %v3881_v4  ;;  %v3894_v9 = vld [vmem:[#allocation2 + $0x98] sm:$0xff]   ;;  %v3880_v10 = vld [vmem:[%s4582_s0] sm:$0xff]   ;;  %v3895_v11 = vld [vmem:[#allocation2 + $0xd0] sm:$0xff]  }
  0x24   :  { %3329 = vmatprep.subr.bf16.mxu1 %v3893_v8  ;;  %v3896_v12 = vld [vmem:[#allocation2 + $0x90] sm:$0xff]   ;;  %v3882_v13 = vld [vmem:[#allocation2 + $0x8] sm:$0xff]   ;;  %v3884_v15 = vld [vmem:[#allocation2 + $0x18] sm:$0xff]  }
  0x25   :  { %3330 = vmatpush3.bf16.msra.mxu1 %v3894_v9  ;;  %v3883_v14 = vld [vmem:[#allocation2 + $0x10] sm:$0xff]   ;;  %v3885_v16 = vld [vmem:[#allocation2 + $0x20] sm:$0xff]   ;;  %v3886_v17 = vld [vmem:[#allocation2 + $0x28] sm:$0xff]  }
  0x26   :  { %3592 = vmatpush3.bf16.msra.mxu0 %v3874_v1  ;;  %3331 = vmatprep.subr.bf16.mxu1 %v3895_v11  ;;  %v3887_v18 = vld [vmem:[#allocation2 + $0x30] sm:$0xff]   ;;  %v3888_v19 = vld [vmem:[#allocation2 + $0x38] sm:$0xff]   ;;  %v3889_v20 = vld [vmem:[#allocation2 + $0x40] sm:$0xff]  }
  0x27   :  { %3593 = vmatprep.subr.bf16.mxu0 %v3875_v2  ;;  %v3890_v21 = vld [vmem:[#allocation2 + $0x48] sm:$0xff]   ;;  %v3891_v22 = vld [vmem:[#allocation2 + $0x50] sm:$0xff]   ;;  %v3892_v23 = vld [vmem:[#allocation2 + $0x58] sm:$0xff]  }
  0x28   :  { %v3897_v24 = vld [vmem:[#allocation2 + $0xc8] sm:$0xff]   ;;  %v3899_v26 = vld [vmem:[#allocation2 + $0xc0] sm:$0xff]   ;;  %v3901_v28 = vld [vmem:[#allocation2 + $0xb8] sm:$0xff]  }
  0x29   :  { %3332 = vmatpush3.bf16.msra.mxu1 %v3896_v12  ;;  %v3898_v25 = vld [vmem:[#allocation2 + $0x88] sm:$0xff]   ;;  %v3900_v27 = vld [vmem:[#allocation2 + $0x80] sm:$0xff]   ;;  %v3902_v29 = vld [vmem:[#allocation2 + $0x78] sm:$0xff]  }
  0x2a   :  { %3594 = vmatpush3.bf16.msra.mxu0 %v3875_v2  ;;  %3333 = vmatprep.subr.bf16.mxu1 %v3897_v24  ;;  %v3903_v30 = vld [vmem:[#allocation2 + $0xb0] sm:$0xff]   ;;  %v3905_v32 = vld [vmem:[#allocation2 + $0xa8] sm:$0xff]   ;;  %v3907_v34 = vld [vmem:[#allocation2 + $0xa0] sm:$0xff]  }
  0x2b   :  { %3595 = vmatprep.subr.bf16.mxu0 %v3876_v3  ;;  %v3904_v31 = vld [vmem:[#allocation2 + $0x70] sm:$0xff]   ;;  %v3906_v33 = vld [vmem:[#allocation2 + $0x68] sm:$0xff]   ;;  %v3908_v35 = vld [vmem:[#allocation2 + $0x60] sm:$0xff]  }
  0x2c   :  { %v3909_v36 = vld [vmem:[#allocation2 + $0x118] sm:$0xff]   ;;  %v3910_v52 = vld [vmem:[#allocation2 + $0x110] sm:$0xff]   ;;  %v3911_v56 = vld [vmem:[#allocation2 + $0x108] sm:$0xff]  }
  0x2d   :  { %3334 = vmatpush3.bf16.msra.mxu1 %v3898_v25  ;;  %v3912_v60 = vld [vmem:[#allocation2 + $0x100] sm:$0xff]   ;;  %v3913_v63 = vld [vmem:[#allocation2 + $0xf8] sm:$0xff]  }
  0x2e   :  { %3596 = vmatpush3.bf16.msra.mxu0 %v3876_v3  ;;  %3335 = vmatprep.subr.bf16.mxu1 %v3899_v26  ;;  %v3914_v3 = vld [vmem:[#allocation2 + $0xf0] sm:$0xff]  }
  0x2f   :  { %3597 = vmatprep.subr.bf16.mxu0 %v3877_v5 }
  0x31   :  { %3336 = vmatpush3.bf16.msra.mxu1 %v3900_v27 }
  0x32   :  { %3598 = vmatpush3.bf16.msra.mxu0 %v3877_v5  ;;  %3337 = vmatprep.subr.bf16.mxu1 %v3901_v28 }
  0x33   :  { %3599 = vmatprep.subr.bf16.mxu0 %v3878_v6 }
  0x35   :  { %3338 = vmatpush3.bf16.msra.mxu1 %v3902_v29 }
  0x36   :  { %3600 = vmatpush3.bf16.msra.mxu0 %v3878_v6  ;;  %3339 = vmatprep.subr.bf16.mxu1 %v3903_v30  ;;  %v3915_v6 = vld [vmem:[#allocation2 + $0xe8] sm:$0xff]  }
  0x37   :  { %3601 = vmatprep.subr.bf16.mxu0 %v3879_v7 }
  0x39   :  { %3340 = vmatpush3.bf16.msra.mxu1 %v3904_v31 }
  0x3a   :  { %3602 = vmatpush3.bf16.msra.mxu0 %v3879_v7  ;;  %3341 = vmatprep.subr.bf16.mxu1 %v3905_v32 }
  0x3b   :  { %3603 = vmatprep.subr.bf16.mxu0 %v3880_v10 }
  0x3d   :  { %3342 = vmatpush3.bf16.msra.mxu1 %v3906_v33 }
  0x3e   :  { %3604 = vmatpush3.bf16.msra.mxu0 %v3880_v10  ;;  %3343 = vmatprep.subr.bf16.mxu1 %v3907_v34  ;;  %v3916_v10 = vld [vmem:[#allocation2 + $0xe0] sm:$0xff]  }
  0x41   :  { %3606 = vmatmul.mubr.bf16.vlgmr.msra.gmra.mxu0 %v3882_v13  ;;  %3344 = vmatpush3.bf16.msra.mxu1 %v3908_v35  ;;  %v3096_v35 = vld [vmem:[%s4583_s1] ss:$0 sm:$0xff] }
  0x42   :  { %3609 = vmatprep.mubr.bf16.mxu0 %v3883_v14  ;;  %3629 = vmatprep.subr.bf16.mxu1 %v3909_v36 }
  0x49   :  { %3610 = vmatmul.mubr.bf16.gmra.mxu0 %v3884_v15 }
  0x4a   :  { %3613 = vmatprep.mubr.bf16.mxu0 %v3885_v16 }
  0x51   :  { %3614 = vmatmul.mubr.bf16.gmra.mxu0 %v3886_v17 }
  0x52   :  { %3617 = vmatprep.mubr.bf16.mxu0 %v3887_v18 }
  0x59   :  { %3618 = vmatmul.mubr.bf16.gmra.mxu0 %v3888_v19 }
  0x5a   :  { %3621 = vmatprep.mubr.bf16.mxu0 %v3889_v20 }
  0x61   :  { %3622 = vmatmul.mubr.bf16.gmra.mxu0 %v3890_v21 }
  0x62   :  { %3625 = vmatprep.mubr.bf16.mxu0 %v3891_v22 }
  0x69   :  { %3626 = vmatmul.mubr.bf16.gmra.mxu0 %v3892_v23 }
 0x101   :  { %v3607_v37 = vpop.f32.mrf.mxu0 }
 0x103   :  { %v299_v38 = vpop.f32.mrf.mxu0 }
 0x105   :  { %v3608_v39 = vpop.f32.mrf.mxu0 }
 0x106   :  { %v397_v59 = vpack.c.bf16 %v3608_v39, %v3607_v37 }
 0x107   :  { %v302_v40 = vpop.f32.mrf.mxu0 }
 0x108   :  { %v394_v50 = vpack.c.bf16 %v302_v40, %v299_v38 }
 0x109   :  { %v3611_v41 = vpop.f32.mrf.mxu0 }
 0x10b   :  { %v315_v42 = vpop.f32.mrf.mxu0 }
 0x10d   :  { %v3612_v43 = vpop.f32.mrf.mxu0 }
 0x10e   :  { %v403_v9 = vpack.c.bf16 %v3612_v43, %v3611_v41 }
 0x10f   :  { %v318_v44 = vpop.f32.mrf.mxu0 }
 0x110   :  { %v400_v2 = vpack.c.bf16 %v318_v44, %v315_v42 }
 0x111   :  { %v3615_v45 = vpop.f32.mrf.mxu0 }
 0x113   :  { %v331_v46 = vpop.f32.mrf.mxu0 }
 0x115   :  { %v3616_v47 = vpop.f32.mrf.mxu0 }
 0x116   :  { %v398_v53 = vpack.c.bf16 %v3616_v47, %v3615_v45 }
 0x117   :  { %v334_v48 = vpop.f32.mrf.mxu0 }
 0x118   :  { %v395_v49 = vpack.c.bf16 %v334_v48, %v331_v46 }
 0x119   :  { %v3619_v51 = vpop.f32.mrf.mxu0 }
 0x11a   :  { %587 = vmatprep.mubr.bf16.mxu1 %v395_v49 }
 0x11b   :  { %588 = vmatmul.mubr.bf16.vlgmr.msra.gmra.mxu1 %v394_v50  ;;  %v347_v54 = vpop.f32.mrf.mxu0 }
 0x11c   :  { %3630 = vmatpush3.bf16.msra.mxu1 %v3909_v36  ;;  %595 = vmatprep.mubr.bf16.mxu1 %v398_v53 }
 0x11d   :  { %3631 = vmatprep.subr.bf16.mxu1 %v3910_v52  ;;  %v3620_v55 = vpop.f32.mrf.mxu0 }
 0x11e   :  { %v404_v5 = vpack.c.bf16 %v3620_v55, %v3619_v51 }
 0x11f   :  { %v350_v57 = vpop.f32.mrf.mxu0 }
 0x120   :  { %3632 = vmatpush3.bf16.msra.mxu1 %v3910_v52  ;;  %v401_v58 = vpack.c.bf16 %v350_v57, %v347_v54 }
 0x121   :  { %3633 = vmatprep.subr.bf16.mxu1 %v3911_v56  ;;  %v3623_v61 = vpop.f32.mrf.mxu0 }
 0x123   :  { %596 = vmatmul.mubr.bf16.gmra.mxu1 %v397_v59  ;;  %v363_v62 = vpop.f32.mrf.mxu0 }
 0x124   :  { %3634 = vmatpush3.bf16.msra.mxu1 %v3911_v56  ;;  %603 = vmatprep.mubr.bf16.mxu1 %v401_v58 }
 0x125   :  { %3635 = vmatprep.subr.bf16.mxu1 %v3912_v60  ;;  %v3624_v0 = vpop.f32.mrf.mxu0 }
 0x126   :  { %v399_v14 = vpack.c.bf16 %v3624_v0, %v3623_v61 }
 0x127   :  { %v366_v1 = vpop.f32.mrf.mxu0 }
 0x128   :  { %3636 = vmatpush3.bf16.msra.mxu1 %v3912_v60  ;;  %v396_v8 = vpack.c.bf16 %v366_v1, %v363_v62 }
 0x129   :  { %3637 = vmatprep.subr.bf16.mxu1 %v3913_v63  ;;  %v3627_v4 = vpop.f32.mrf.mxu0 }
 0x12b   :  { %604 = vmatmul.mubr.bf16.gmra.mxu1 %v400_v2  ;;  %v379_v7 = vpop.f32.mrf.mxu0 }
 0x12c   :  { %3638 = vmatpush3.bf16.msra.mxu1 %v3913_v63  ;;  %611 = vmatprep.mubr.bf16.mxu1 %v404_v5 }
 0x12d   :  { %3639 = vmatprep.subr.bf16.mxu1 %v3914_v3  ;;  %v3628_v11 = vpop.f32.mrf.mxu0 }
 0x12e   :  { %v405_v15 = vpack.c.bf16 %v3628_v11, %v3627_v4 }
 0x12f   :  { %v382_v12 = vpop.f32.mrf.mxu0 }
 0x130   :  { %3640 = vmatpush3.bf16.msra.mxu1 %v3914_v3  ;;  %v402_v13 = vpack.c.bf16 %v382_v12, %v379_v7 }
 0x131   :  { %3641 = vmatprep.subr.bf16.mxu1 %v3915_v6 }
 0x133   :  { %612 = vmatmul.mubr.bf16.gmra.mxu1 %v403_v9 }
 0x134   :  { %3642 = vmatpush3.bf16.msra.mxu1 %v3915_v6  ;;  %3645 = vmatprep.mubr.bf16.mxu1 %v396_v8 }
 0x135   :  { %3643 = vmatprep.subr.bf16.mxu1 %v3916_v10 }
 0x138   :  { %3644 = vmatpush3.bf16.msra.mxu1 %v3916_v10 }
 0x13b   :  { %3646 = vmatmul.mubr.bf16.vlgmr.msra.gmra.mxu1 %v399_v14 }
 0x13c   :  { %3649 = vmatprep.mubr.bf16.mxu1 %v402_v13 }
 0x143   :  { %3650 = vmatmul.mubr.bf16.gmra.mxu1 %v405_v15 }
 0x1db   :  { %v3345_v16 = vpop.f32.mrf.mxu1 }
 0x1dd   :  { %v3346_v17 = vpop.f32.mrf.mxu1 }
 0x1de   :  { %v3347_v33 = vadd.f32 %v3346_v17, %v3345_v16 }
 0x1df   :  { %v3348_v18 = vpop.f32.mrf.mxu1 }
 0x1e0   :  { %v590_v41 = vadd.f32 %v3347_v33, %v3096_v35 }
 0x1e1   :  { %v3349_v19 = vpop.f32.mrf.mxu1 }
 0x1e2   :  { %v3350_v37 = vadd.f32 %v3349_v19, %v3348_v18 }
 0x1e3   :  { %v3351_v20 = vpop.f32.mrf.mxu1 }
 0x1e4   :  { %v593_v47 = vadd.f32 %v3350_v37, %v3096_v35 }
 0x1e5   :  { %v3352_v21 = vpop.f32.mrf.mxu1 }
 0x1e6   :  { %v3353_v31 = vadd.f32 %v3352_v21, %v3351_v20 }
 0x1e7   :  { %v3354_v22 = vpop.f32.mrf.mxu1 }
 0x1e8   :  { %v598_v38 = vadd.f32 %v3353_v31, %v3096_v35 }
 0x1e9   :  { %v3355_v23 = vpop.f32.mrf.mxu1 }
 0x1ea   :  { %v3356_v34 = vadd.f32 %v3355_v23, %v3354_v22 }
 0x1eb   :  { %v3357_v24 = vpop.f32.mrf.mxu1 }
 0x1ec   :  { %v601_v42 = vadd.f32 %v3356_v34, %v3096_v35 }
 0x1ed   :  { %v3358_v25 = vpop.f32.mrf.mxu1 }
 0x1ee   :  { %v3359_v48 = vadd.f32 %v3358_v25, %v3357_v24 }
 0x1ef   :  { %v3360_v26 = vpop.f32.mrf.mxu1 }
 0x1f0   :  { %v606_v63 = vadd.f32 %v3359_v48, %v3096_v35 }
 0x1f1   :  { %v3361_v27 = vpop.f32.mrf.mxu1 }
 0x1f2   :  { %v3362_v54 = vadd.f32 %v3361_v27, %v3360_v26 }
 0x1f3   :  { %v3363_v28 = vpop.f32.mrf.mxu1 }
 0x1f4   :  { %v609_v4 = vadd.f32 %v3362_v54, %v3096_v35 }
 0x1f5   :  { %v3364_v29 = vpop.f32.mrf.mxu1 }
 0x1f6   :  { %v3365_v44 = vadd.f32 %v3364_v29, %v3363_v28 }
 0x1f7   :  { %v3366_v30 = vpop.f32.mrf.mxu1 }
 0x1f8   :  { %v614_v59 = vadd.f32 %v3365_v44, %v3096_v35 }
 0x1f9   :  { %v3367_v32 = vpop.f32.mrf.mxu1 }
 0x1fa   :  { %v3368_v50 = vadd.f32 %v3367_v32, %v3366_v30 }
 0x1fb   :  { %v3647_v36 = vpop.f32.mrf.mxu1 }
 0x1fc   :  { %v663_v40 = vadd.f32 %v3647_v36, %v598_v38  ;;  %v617_v0 = vadd.f32 %v3368_v50, %v3096_v35 }
 0x1fd   :  { %v654_v39 = vpop.f32.mrf.mxu1 }
 0x1fe   :  { %v655_v45 = vadd.f32 %v654_v39, %v590_v41  ;;  %v687_v51 = vmax.f32 %v663_v40, 0.0 }
 0x1ff   :  { %v3648_v43 = vpop.f32.mrf.mxu1 }
 0x200   :  { %v666_v46 = vadd.f32 %v3648_v43, %v601_v42  ;;  %v685_v56 = vmax.f32 %v655_v45, 0.0 }
 0x201   :  { %v657_v49 = vpop.f32.mrf.mxu1 }
 0x202   :  { %v688_v52 = vmax.f32 %v666_v46, 0.0  ;;  %v658_v53 = vadd.f32 %v657_v49, %v593_v47 }
 0x203   :  { %v3651_v55 = vpop.f32.mrf.mxu1 }
 0x204   :  { %v694_v57 = vpack.c.bf16 %v688_v52, %v687_v51  ;;  %v686_v58 = vmax.f32 %v658_v53, 0.0  ;;  %v679_v62 = vadd.f32 %v3651_v55, %v614_v59 }
 0x205   :  { %v670_v60 = vpop.f32.mrf.mxu1 }
 0x206   :  { %v693_v61 = vpack.c.bf16 %v686_v58, %v685_v56  ;;  %v671_v2 = vadd.f32 %v670_v60, %v606_v63  ;;  %v691_v6 = vmax.f32 %v679_v62, 0.0 }
 0x207   :  { %v3652_v1 = vpop.f32.mrf.mxu1 }
 0x208   :  { %v682_v3 = vadd.f32 %v3652_v1, %v617_v0  ;;  %v689_v9 = vmax.f32 %v671_v2, 0.0 }
 0x209   :  { %v673_v5 = vpop.f32.mrf.mxu1 }
 0x20a   :  { %v692_v7 = vmax.f32 %v682_v3, 0.0  ;;  %v674_v8 = vadd.f32 %v673_v5, %v609_v4 }
 0x20c   :  { %v696_v10 = vpack.c.bf16 %v692_v7, %v691_v6  ;;  %v690_v11 = vmax.f32 %v674_v8, 0.0 }
 0x20e   :  { %v695_v12 = vpack.c.bf16 %v690_v11, %v689_v9  ;;  %3653 = vmatprep.subr.bf16.mxu1 %v696_v10 }
 0x20f   :  { %4320 = dma.done.wait [#allocation3 + $0x1], 3840 }
 0x210   :  { %4321 = vsyncadd [#allocation3 + $0x1], 4294963456  ;;  %s701_s24 = scalar_lea.hbm %s4584_s2, 11904  ;;  %3654 = vmatpush3.bf16.msra.mxu1 %v696_v10  ;;  %s4343_s25 = smov [#allocation2 + $0x2e8]  }
 0x211   :  { %s711_s26 = sshll.u32 %s4343_s25, 4  ;;  %3655 = vmatprep.subr.bf16.mxu1 %v695_v12  ;;  %s712_s26 = int_to_ptr.vmem [resolvable:$true] %s711_s26 }
 0x212   :  { %s4147_s27 = scalar_lea.vmem %s712_s26, 3328  ;;  %p4152_p2 = scmp.lt.s32.totalorder %s712_s26, %s4376_s16 }
 0x213   :  { %p4148_p1 = scmp.ne.s32.totalorder %s712_s26, %s4147_s27  ;;  %p4153_p3 = scmp.lt.s32.totalorder %s4381_s20, %s4147_s27 }
 0x215   :  { %p4154_p4 = por %p4153_p3, %p4152_p2 }
 0x217   :  { %p4155_p5 = pnand %p4154_p4, %p4148_p1 }
 0x219   :  { %4158 = shalt.err (!%p4155_p5)  }
 0x21a   :  { %714 = dma.hbm_to_vmem [thread:$0]  %s701_s24, 3328, %s712_s26, [#allocation3 + $0x3]  ;;  %3656 = vmatpush3.bf16.msra.mxu1 %v695_v12  ;;  %vm805_vm0 = vcmask 523264   ;;  %v3133_v4 = vld [vmem:[%s4583_s1 + $0x1] ss:$0 sm:$0xff] }
 0x21b   :  { %3657 = vmatprep.subr.bf16.mxu1 %v694_v57  ;;  %v3917_v13 = vld [vmem:[#allocation2 + $0x120] sm:$0xff]   ;;  %v3918_v14 = vld [vmem:[#allocation2 + $0x128] sm:$0xff]   ;;  %v3919_v15 = vld [vmem:[#allocation2 + $0x130] sm:$0xff]  }
 0x21c   :  { %3661 = vmatprep.mubr.msk.bf16.mxu1 %vm805_vm0, %v3917_v13  ;;  %v3923_v16 = vld [vmem:[#allocation2 + $0x1c8] sm:$0xff]   ;;  %v3920_v18 = vld [vmem:[#allocation2 + $0x138] sm:$0xff]   ;;  %v3925_v19 = vld [vmem:[#allocation2 + $0x1c0] sm:$0xff]  }
 0x21d   :  { %v3924_v17 = vld [vmem:[#allocation2 + $0x188] sm:$0xff]   ;;  %v3921_v20 = vld [vmem:[#allocation2 + $0x140] sm:$0xff]   ;;  %v3927_v22 = vld [vmem:[#allocation2 + $0x1b8] sm:$0xff]  }
 0x21e   :  { %3658 = vmatpush3.bf16.msra.mxu1 %v694_v57  ;;  %v3926_v21 = vld [vmem:[#allocation2 + $0x180] sm:$0xff]   ;;  %v3928_v23 = vld [vmem:[#allocation2 + $0x208] sm:$0xff]   ;;  %v3929_v24 = vld [vmem:[#allocation2 + $0x178] sm:$0xff]  }
 0x21f   :  { %3659 = vmatprep.subr.bf16.mxu1 %v693_v61  ;;  %3673 = vmatprep.subr.bf16.mxu0 %v3928_v23  ;;  %v3930_v25 = vld [vmem:[#allocation2 + $0x1b0] sm:$0xff]   ;;  %v3931_v26 = vld [vmem:[#allocation2 + $0x200] sm:$0xff]   ;;  %v3922_v28 = vld [vmem:[#allocation2 + $0x148] sm:$0xff]  }
 0x220   :  { %3674 = vmatpush3.bf16.msra.mxu0 %v3928_v23  ;;  %v3932_v27 = vld [vmem:[#allocation2 + $0x170] sm:$0xff]   ;;  %v3933_v29 = vld [vmem:[#allocation2 + $0x1a8] sm:$0xff]   ;;  %v3934_v30 = vld [vmem:[#allocation2 + $0x1f8] sm:$0xff]  }
 0x221   :  { %3675 = vmatprep.subr.bf16.mxu0 %v3931_v26  ;;  %v3935_v31 = vld [vmem:[#allocation2 + $0x168] sm:$0xff]   ;;  %v3936_v32 = vld [vmem:[#allocation2 + $0x1a0] sm:$0xff]   ;;  %v3937_v33 = vld [vmem:[#allocation2 + $0x1f0] sm:$0xff]  }
 0x222   :  { %3660 = vmatpush3.bf16.msra.mxu1 %v693_v61  ;;  %v3938_v34 = vld [vmem:[#allocation2 + $0x160] sm:$0xff]   ;;  %v3939_v35 = vld [vmem:[#allocation2 + $0x198] sm:$0xff]   ;;  %v3940_v36 = vld [vmem:[#allocation2 + $0x1e8] sm:$0xff]  }
 0x223   :  { %3391 = vmatprep.subr.bf16.mxu1 %v3923_v16  ;;  %v3941_v37 = vld [vmem:[#allocation2 + $0x158] sm:$0xff]   ;;  %v3942_v38 = vld [vmem:[#allocation2 + $0x190] sm:$0xff]   ;;  %v3943_v39 = vld [vmem:[#allocation2 + $0x1e0] sm:$0xff]  }
 0x224   :  { %3676 = vmatpush3.bf16.msra.mxu0 %v3931_v26  ;;  %v3944_v40 = vld [vmem:[#allocation2 + $0x150] sm:$0xff]   ;;  %v3945_v41 = vld [vmem:[#allocation2 + $0x1d8] sm:$0xff]  }
 0x225   :  { %3662 = vmatmul.mubr.msk.bf16.vlgmr.msra.gmra.mxu1 %vm805_vm0, %v3918_v14  ;;  %3677 = vmatprep.subr.bf16.mxu0 %v3934_v30  ;;  %v3946_v42 = vld [vmem:[#allocation2 + $0x1d0] sm:$0xff]  }
 0x226   :  { %3665 = vmatprep.mubr.msk.bf16.mxu1 %vm805_vm0, %v3919_v15  ;;  %3392 = vmatpush3.bf16.msra.mxu1 %v3924_v17 }
 0x227   :  { %3393 = vmatprep.subr.bf16.mxu1 %v3925_v19 }
 0x228   :  { %3678 = vmatpush3.bf16.msra.mxu0 %v3934_v30 }
 0x229   :  { %3679 = vmatprep.subr.bf16.mxu0 %v3937_v33 }
 0x22a   :  { %3394 = vmatpush3.bf16.msra.mxu1 %v3926_v21 }
 0x22b   :  { %3395 = vmatprep.subr.bf16.mxu1 %v3927_v22 }
 0x22c   :  { %3680 = vmatpush3.bf16.msra.mxu0 %v3937_v33 }
 0x22d   :  { %3666 = vmatmul.mubr.msk.bf16.gmra.mxu1 %vm805_vm0, %v3920_v18  ;;  %3681 = vmatprep.subr.bf16.mxu0 %v3940_v36 }
 0x22e   :  { %3669 = vmatprep.mubr.msk.bf16.mxu1 %vm805_vm0, %v3921_v20  ;;  %3396 = vmatpush3.bf16.msra.mxu1 %v3929_v24 }
 0x22f   :  { %3397 = vmatprep.subr.bf16.mxu1 %v3930_v25 }
 0x230   :  { %3682 = vmatpush3.bf16.msra.mxu0 %v3940_v36 }
 0x231   :  { %3683 = vmatprep.subr.bf16.mxu0 %v3943_v39 }
 0x232   :  { %3398 = vmatpush3.bf16.msra.mxu1 %v3932_v27 }
 0x233   :  { %3399 = vmatprep.subr.bf16.mxu1 %v3933_v29 }
 0x234   :  { %3684 = vmatpush3.bf16.msra.mxu0 %v3943_v39 }
 0x235   :  { %3670 = vmatmul.mubr.msk.bf16.gmra.mxu1 %vm805_vm0, %v3922_v28  ;;  %3685 = vmatprep.subr.bf16.mxu0 %v3945_v41 }
 0x236   :  { %3400 = vmatpush3.bf16.msra.mxu1 %v3935_v31 }
 0x237   :  { %3401 = vmatprep.subr.bf16.mxu1 %v3936_v32 }
 0x238   :  { %3686 = vmatpush3.bf16.msra.mxu0 %v3945_v41 }
 0x239   :  { %3687 = vmatprep.subr.bf16.mxu0 %v3946_v42 }
 0x23a   :  { %3402 = vmatpush3.bf16.msra.mxu1 %v3938_v34 }
 0x23b   :  { %3403 = vmatprep.subr.bf16.mxu1 %v3939_v35 }
 0x23c   :  { %3688 = vmatpush3.bf16.msra.mxu0 %v3946_v42 }
 0x23e   :  { %3404 = vmatpush3.bf16.msra.mxu1 %v3941_v37 }
 0x23f   :  { %3405 = vmatprep.subr.bf16.mxu1 %v3942_v38 }
 0x242   :  { %3406 = vmatpush3.bf16.msra.mxu1 %v3944_v40 }
 0x2e5   :  { %v3663_v43 = vpop.f32.mrf.mxu1 }
 0x2e7   :  { %v858_v44 = vpop.f32.mrf.mxu1 }
 0x2e9   :  { %v3664_v45 = vpop.f32.mrf.mxu1 }
 0x2ea   :  { %v908_v59 = vpack.c.bf16 %v3664_v45, %v3663_v43 }
 0x2eb   :  { %v861_v46 = vpop.f32.mrf.mxu1 }
 0x2ec   :  { %v905_v52 = vpack.c.bf16 %v861_v46, %v858_v44 }
 0x2ed   :  { %v3667_v47 = vpop.f32.mrf.mxu1 }
 0x2ef   :  { %v874_v48 = vpop.f32.mrf.mxu1 }
 0x2f1   :  { %v3668_v49 = vpop.f32.mrf.mxu1 }
 0x2f2   :  { %v909_v54 = vpack.c.bf16 %v3668_v49, %v3667_v47 }
 0x2f3   :  { %v877_v50 = vpop.f32.mrf.mxu1 }
 0x2f4   :  { %v906_v51 = vpack.c.bf16 %v877_v50, %v874_v48 }
 0x2f5   :  { %v3671_v53 = vpop.f32.mrf.mxu1 }
 0x2f6   :  { %1092 = vmatprep.mubr.bf16.mxu1 %v906_v51 }
 0x2f7   :  { %v890_v55 = vpop.f32.mrf.mxu1  ;;  %1093 = vmatmul.mubr.bf16.vlgmr.msra.gmra.mxu1 %v905_v52 }
 0x2f8   :  { %1100 = vmatprep.mubr.bf16.mxu1 %v909_v54 }
 0x2f9   :  { %v3672_v56 = vpop.f32.mrf.mxu1 }
 0x2fa   :  { %v910_v60 = vpack.c.bf16 %v3672_v56, %v3671_v53 }
 0x2fb   :  { %v893_v57 = vpop.f32.mrf.mxu1 }
 0x2fc   :  { %v907_v58 = vpack.c.bf16 %v893_v57, %v890_v55 }
 0x2fe   :  { %3689 = vmatprep.mubr.bf16.mxu0 %v907_v58 }
 0x2ff   :  { %1101 = vmatmul.mubr.bf16.gmra.mxu1 %v908_v59  ;;  %3690 = vmatmul.mubr.bf16.vlgmr.msra.gmra.mxu0 %v910_v60 }
 0x3b7   :  { %v3407_v61 = vpop.f32.mrf.mxu1 }
 0x3b9   :  { %v3408_v62 = vpop.f32.mrf.mxu1 }
 0x3ba   :  { %v3409_v1 = vadd.f32 %v3408_v62, %v3407_v61 }
 0x3bb   :  { %v3410_v63 = vpop.f32.mrf.mxu1 }
 0x3bc   :  { %v1095_v9 = vadd.f32 %v3409_v1, %v3133_v4 }
 0x3bd   :  { %v3411_v0 = vpop.f32.mrf.mxu1 }
 0x3be   :  { %v3412_v5 = vadd.f32 %v3411_v0, %v3410_v63 }
 0x3bf   :  { %v3413_v2 = vpop.f32.mrf.mxu1  ;;  %v3691_v3 = vpop.f32.mrf.mxu0 }
 0x3c0   :  { %v1098_v14 = vadd.f32 %v3412_v5, %v3133_v4 }
 0x3c1   :  { %v3414_v6 = vpop.f32.mrf.mxu1  ;;  %v1143_v7 = vpop.f32.mrf.mxu0 }
 0x3c2   :  { %v3415_v8 = vadd.f32 %v3414_v6, %v3413_v2  ;;  %v1144_v13 = vadd.f32 %v1143_v7, %v1095_v9 }
 0x3c3   :  { %v3416_v10 = vpop.f32.mrf.mxu1  ;;  %v3692_v11 = vpop.f32.mrf.mxu0 }
 0x3c4   :  { %v1103_v12 = vadd.f32 %v3415_v8, %v3133_v4  ;;  %v1158_v20 = vmax.f32 %v1144_v13, 0.0 }
 0x3c5   :  { %v3417_v15 = vpop.f32.mrf.mxu1  ;;  %v1146_v16 = vpop.f32.mrf.mxu0 }
 0x3c6   :  { %v3418_v17 = vadd.f32 %v3417_v15, %v3416_v10  ;;  %v1147_v18 = vadd.f32 %v1146_v16, %v1098_v14  ;;  %v1152_v19 = vadd.f32 %v3691_v3, %v1103_v12 }
 0x3c8   :  { %v1106_v21 = vadd.f32 %v3418_v17, %v3133_v4  ;;  %v1159_v22 = vmax.f32 %v1147_v18, 0.0  ;;  %v1160_v25 = vmax.f32 %v1152_v19, 0.0 }
 0x3ca   :  { %v1155_v23 = vadd.f32 %v3692_v11, %v1106_v21  ;;  %v1162_v24 = vpack.c.bf16 %v1159_v22, %v1158_v20 }
 0x3cc   :  { %v1161_v26 = vmax.f32 %v1155_v23, 0.0 }
 0x3ce   :  { %v1163_v27 = vpack.c.bf16 %v1161_v26, %v1160_v25 }
 0x3cf   :  { %4322 = dma.done.wait [#allocation3 + $0x2], 3456 }
 0x3d0   :  { %4323 = vsyncadd [#allocation3 + $0x2], 4294963840  ;;  %s1168_s5 = scalar_lea.hbm %s4584_s2, 15232  ;;  %s4344_s6 = smov [#allocation2 + $0x3b8]   ;;  %v4345_v28 = vmov 0.0   ;;  %vm4346_vm1 = vmmov 0  }
 0x3d1   :  { %s1178_s7 = sshll.u32 %s4344_s6, 4  ;;  %3693 = vmatprep.subr.bf16.mxu0 %v4345_v28  ;;  %3697 = vmatprep.mubr.msk.bf16.mxu0 %vm4346_vm1, %v4345_v28  ;;  %s1179_s7 = int_to_ptr.vmem [resolvable:$true] %s1178_s7 }
 0x3d2   :  { %3694 = vmatpush3.bf16.msra.mxu0 %v1163_v27  ;;  %3709 = vmatprep.subr.bf16.mxu1 %v4345_v28  ;;  %s4170_s8 = scalar_lea.vmem %s1179_s7, 3328  ;;  %p4175_p7 = scmp.lt.s32.totalorder %s1179_s7, %s4376_s16 }
 0x3d3   :  { %p4171_p6 = scmp.ne.s32.totalorder %s1179_s7, %s4170_s8  ;;  %p4176_p8 = scmp.lt.s32.totalorder %s4381_s20, %s4170_s8 }
 0x3d5   :  { %p4177_p9 = por %p4176_p8, %p4175_p7 }
 0x3d7   :  { %p4178_p10 = pnand %p4177_p9, %p4171_p6 }
 0x3d9   :  { %4181 = shalt.err (!%p4178_p10)  }
 0x3da   :  { %1181 = dma.hbm_to_vmem [thread:$0]  %s1168_s5, 3328, %s1179_s7, [#allocation3 + $0x4]  ;;  %3695 = vmatprep.subr.bf16.mxu0 %v4345_v28  ;;  %3725 = vmatprep.mubr.msk.bf16.mxu1 %vm4346_vm1, %v4345_v28  ;;  %vm1251_vm2 = vcmask 261120   ;;  %v3164_v10 = vld [vmem:[%s4583_s1 + $0x2] ss:$0 sm:$0xff] }
 0x3db   :  { %3696 = vmatpush3.bf16.msra.mxu0 %v1162_v24  ;;  %v3947_v29 = vld [vmem:[#allocation2 + $0x210] sm:$0xff]   ;;  %v3950_v30 = vld [vmem:[#allocation2 + $0x2a0] sm:$0xff]   ;;  %v3948_v31 = vld [vmem:[#allocation2 + $0x218] sm:$0xff]  }
 0x3dc   :  { %v3951_v32 = vld [vmem:[#allocation2 + $0x260] sm:$0xff]   ;;  %3434 = vmatprep.subr.bf16.mxu0 %v3950_v30  ;;  %v3952_v33 = vld [vmem:[#allocation2 + $0x298] sm:$0xff]   ;;  %v3954_v35 = vld [vmem:[#allocation2 + $0x290] sm:$0xff]  }
 0x3dd   :  { %v3953_v34 = vld [vmem:[#allocation2 + $0x258] sm:$0xff]   ;;  %v3955_v36 = vld [vmem:[#allocation2 + $0x2e0] sm:$0xff]   ;;  %v3956_v37 = vld [vmem:[#allocation2 + $0x250] sm:$0xff]  }
 0x3de   :  { %3698 = vmatmul.mubr.msk.bf16.vlgmr.msra.gmra.mxu0 %vm1251_vm2, %v3947_v29  ;;  %3710 = vmatpush3.bf16.msra.mxu1 %v3955_v36  ;;  %v3958_v38 = vld [vmem:[#allocation2 + $0x2d8] sm:$0xff]   ;;  %v3949_v39 = vld [vmem:[#allocation2 + $0x220] sm:$0xff]   ;;  %v3957_v40 = vld [vmem:[#allocation2 + $0x288] sm:$0xff]  }
 0x3df   :  { %3701 = vmatprep.mubr.msk.bf16.mxu0 %vm4346_vm1, %v4345_v28  ;;  %3435 = vmatpush3.bf16.msra.mxu0 %v3951_v32  ;;  %v3959_v41 = vld [vmem:[#allocation2 + $0x248] sm:$0xff]   ;;  %v3960_v42 = vld [vmem:[#allocation2 + $0x280] sm:$0xff]   ;;  %v3961_v43 = vld [vmem:[#allocation2 + $0x2d0] sm:$0xff]  }
 0x3e0   :  { %3436 = vmatprep.subr.bf16.mxu0 %v3952_v33  ;;  %3711 = vmatprep.subr.bf16.mxu1 %v4345_v28  ;;  %v3962_v44 = vld [vmem:[#allocation2 + $0x240] sm:$0xff]   ;;  %v3963_v45 = vld [vmem:[#allocation2 + $0x278] sm:$0xff]   ;;  %v3964_v46 = vld [vmem:[#allocation2 + $0x2c8] sm:$0xff]  }
 0x3e1   :  { %v3965_v47 = vld [vmem:[#allocation2 + $0x238] sm:$0xff]   ;;  %v3966_v48 = vld [vmem:[#allocation2 + $0x270] sm:$0xff]   ;;  %v3967_v49 = vld [vmem:[#allocation2 + $0x2c0] sm:$0xff]  }
 0x3e2   :  { %3712 = vmatpush3.bf16.msra.mxu1 %v3958_v38  ;;  %v3968_v50 = vld [vmem:[#allocation2 + $0x230] sm:$0xff]   ;;  %v3969_v51 = vld [vmem:[#allocation2 + $0x268] sm:$0xff]   ;;  %v3970_v52 = vld [vmem:[#allocation2 + $0x2b8] sm:$0xff]  }
 0x3e3   :  { %3437 = vmatpush3.bf16.msra.mxu0 %v3953_v34  ;;  %3713 = vmatprep.subr.bf16.mxu1 %v4345_v28  ;;  %v3971_v53 = vld [vmem:[#allocation2 + $0x228] sm:$0xff]   ;;  %v3972_v54 = vld [vmem:[#allocation2 + $0x2b0] sm:$0xff]  }
 0x3e4   :  { %3438 = vmatprep.subr.bf16.mxu0 %v3954_v35  ;;  %v3973_v55 = vld [vmem:[#allocation2 + $0x2a8] sm:$0xff]  }
 0x3e6   :  { %3702 = vmatmul.mubr.msk.bf16.gmra.mxu0 %vm1251_vm2, %v3948_v31  ;;  %3714 = vmatpush3.bf16.msra.mxu1 %v3961_v43 }
 0x3e7   :  { %3705 = vmatprep.mubr.msk.bf16.mxu0 %vm4346_vm1, %v4345_v28  ;;  %3439 = vmatpush3.bf16.msra.mxu0 %v3956_v37 }
 0x3e8   :  { %3440 = vmatprep.subr.bf16.mxu0 %v3957_v40  ;;  %3715 = vmatprep.subr.bf16.mxu1 %v4345_v28 }
 0x3ea   :  { %3716 = vmatpush3.bf16.msra.mxu1 %v3964_v46 }
 0x3eb   :  { %3441 = vmatpush3.bf16.msra.mxu0 %v3959_v41  ;;  %3717 = vmatprep.subr.bf16.mxu1 %v4345_v28 }
 0x3ec   :  { %3442 = vmatprep.subr.bf16.mxu0 %v3960_v42 }
 0x3ee   :  { %3706 = vmatmul.mubr.msk.bf16.gmra.mxu0 %vm1251_vm2, %v3949_v39  ;;  %3718 = vmatpush3.bf16.msra.mxu1 %v3967_v49 }
 0x3ef   :  { %3443 = vmatpush3.bf16.msra.mxu0 %v3962_v44  ;;  %3719 = vmatprep.subr.bf16.mxu1 %v4345_v28 }
 0x3f0   :  { %3444 = vmatprep.subr.bf16.mxu0 %v3963_v45 }
 0x3f2   :  { %3720 = vmatpush3.bf16.msra.mxu1 %v3970_v52 }
 0x3f3   :  { %3445 = vmatpush3.bf16.msra.mxu0 %v3965_v47  ;;  %3721 = vmatprep.subr.bf16.mxu1 %v4345_v28 }
 0x3f4   :  { %3446 = vmatprep.subr.bf16.mxu0 %v3966_v48 }
 0x3f6   :  { %3722 = vmatpush3.bf16.msra.mxu1 %v3972_v54 }
 0x3f7   :  { %3447 = vmatpush3.bf16.msra.mxu0 %v3968_v50  ;;  %3723 = vmatprep.subr.bf16.mxu1 %v4345_v28 }
 0x3f8   :  { %3448 = vmatprep.subr.bf16.mxu0 %v3969_v51 }
 0x3fa   :  { %3724 = vmatpush3.bf16.msra.mxu1 %v3973_v55 }
 0x3fb   :  { %3449 = vmatpush3.bf16.msra.mxu0 %v3971_v53 }
 0x49e   :  { %v1295_v56 = vpop.f32.mrf.mxu0 }
 0x4a0   :  { %v3699_v57 = vpop.f32.mrf.mxu0 }
 0x4a2   :  { %v1298_v58 = vpop.f32.mrf.mxu0 }
 0x4a3   :  { %v1318_v0 = vpack.c.bf16 %v1298_v58, %v1295_v56 }
 0x4a4   :  { %v3700_v59 = vpop.f32.mrf.mxu0 }
 0x4a6   :  { %v1303_v60 = vpop.f32.mrf.mxu0 }
 0x4a8   :  { %v3703_v61 = vpop.f32.mrf.mxu0 }
 0x4aa   :  { %v1306_v62 = vpop.f32.mrf.mxu0 }
 0x4ab   :  { %v1319_v63 = vpack.c.bf16 %v1306_v62, %v1303_v60 }
 0x4ac   :  { %v3704_v1 = vpop.f32.mrf.mxu0 }
 0x4ad   :  { %1502 = vmatprep.mubr.bf16.mxu0 %v1319_v63 }
 0x4ae   :  { %v1311_v2 = vpop.f32.mrf.mxu0  ;;  %1503 = vmatmul.mubr.bf16.vlgmr.msra.gmra.mxu0 %v1318_v0 }
 0x4b0   :  { %v3707_v3 = vpop.f32.mrf.mxu0 }
 0x4b2   :  { %v1314_v4 = vpop.f32.mrf.mxu0 }
 0x4b3   :  { %v1320_v5 = vpack.c.bf16 %v1314_v4, %v1311_v2 }
 0x4b4   :  { %v3708_v6 = vpop.f32.mrf.mxu0 }
 0x4b5   :  { %3726 = vmatmul.mubr.bf16.vlgmr.msra.gmra.mxu1 %v1320_v5 }
 0x56e   :  { %v3450_v7 = vpop.f32.mrf.mxu0 }
 0x570   :  { %v3451_v8 = vpop.f32.mrf.mxu0 }
 0x571   :  { %v3452_v9 = vadd.f32 %v3451_v8, %v3450_v7 }
 0x572   :  { %v3453_v11 = vpop.f32.mrf.mxu0 }
 0x573   :  { %v1505_v13 = vadd.f32 %v3452_v9, %v3164_v10 }
 0x574   :  { %v3454_v12 = vpop.f32.mrf.mxu0 }
 0x575   :  { %v3455_v14 = vadd.f32 %v3454_v12, %v3453_v11  ;;  %v1545_v15 = vpop.f32.mrf.mxu1 }
 0x576   :  { %v1546_v18 = vadd.f32 %v1545_v15, %v1505_v13 }
 0x577   :  { %v3727_v16 = vpop.f32.mrf.mxu1  ;;  %v1508_v17 = vadd.f32 %v3455_v14, %v3164_v10 }
 0x578   :  { %v1552_v22 = vmax.f32 %v1546_v18, 0.0 }
 0x579   :  { %v1548_v19 = vpop.f32.mrf.mxu1 }
 0x57a   :  { %v1549_v20 = vadd.f32 %v1548_v19, %v1508_v17 }
 0x57b   :  { %v3728_v21 = vpop.f32.mrf.mxu1 }
 0x57c   :  { %v1553_v23 = vmax.f32 %v1549_v20, 0.0 }
 0x57e   :  { %v1554_v24 = vpack.c.bf16 %v1553_v23, %v1552_v22 }
 0x57f   :  { %4324 = dma.done.wait [#allocation3 + $0x3], 3328 }
 0x580   :  { %4325 = vsyncadd [#allocation3 + $0x3], 4294963968  ;;  %s1559_s13 = scalar_lea.hbm %s4584_s2, 18560  ;;  %3729 = vmatprep.subr.bf16.mxu0 %v1554_v24  ;;  %s4347_s14 = smov [#allocation2 + $0x488]  }
 0x581   :  { %s1569_s15 = sshll.u32 %s4347_s14, 4  ;;  %3730 = vmatpush3.bf16.msra.mxu0 %v1554_v24  ;;  %s1570_s15 = int_to_ptr.vmem [resolvable:$true] %s1569_s15 }
 0x582   :  { %3735 = vmatprep.subr.bf16.mxu0 %v4345_v28  ;;  %s4193_s17 = scalar_lea.vmem %s1570_s15, 2176  ;;  %p4198_p12 = scmp.lt.s32.totalorder %s1570_s15, %s4376_s16 }
 0x583   :  { %p4194_p11 = scmp.ne.s32.totalorder %s1570_s15, %s4193_s17  ;;  %p4199_p13 = scmp.lt.s32.totalorder %s4381_s20, %s4193_s17 }
 0x585   :  { %p4200_p0 = por %p4199_p13, %p4198_p12 }
 0x587   :  { %p4201_p1 = pnand %p4200_p0, %p4194_p11 }
 0x589   :  { %4204 = shalt.err (!%p4201_p1)  }
 0x58a   :  { %1572 = dma.hbm_to_vmem [thread:$0]  %s1559_s13, 2176, %s1570_s15, [#allocation3 + $0x5]  ;;  %vm1632_vm3 = vcmask 130048   ;;  %v3193_v0 = vld [vmem:[%s4583_s1 + $0x3] ss:$0 sm:$0xff] }
 0x58b   :  { %v3974_v25 = vld [vmem:[#allocation2 + $0x2e8] sm:$0xff]   ;;  %v3975_v26 = vld [vmem:[#allocation2 + $0x2f0] ss:$0 sps:$4 sm:$0xff]   ;;  %v3980_v32 = vld [vmem:[#allocation2 + $0x3a0] sm:$0xff]  }
 0x58c   :  { %3731 = vmatprep.mubr.msk.bf16.mxu0 %vm1632_vm3, %v3974_v25  ;;  %v3976_v27 = vld [vmem:[#allocation2 + $0x3b0] sm:$0xff]   ;;  %v3977_v29 = vld [vmem:[#allocation2 + $0x3a8] sm:$0xff]   ;;  %v3984_v35 = vld [vmem:[#allocation2 + $0x360] sm:$0xff]  }
 0x58d   :  { %3732 = vmatmul.mubr.msk.bf16.vlgmr.msra.gmra.mxu0 %vm1632_vm3, %v3975_v26  ;;  %v3978_v30 = vld [vmem:[#allocation2 + $0x370] sm:$0xff]   ;;  %v3981_v33 = vld [vmem:[#allocation2 + $0x368] sm:$0xff]   ;;  %v3985_v36 = vld [vmem:[#allocation2 + $0x320] sm:$0xff]  }
 0x58e   :  { %3736 = vmatpush3.bf16.msra.mxu0 %v3976_v27  ;;  %3751 = vmatprep.mubr.msk.bf16.mxu0 %vm4346_vm1, %v4345_v28  ;;  %v3979_v31 = vld [vmem:[#allocation2 + $0x330] sm:$0xff]   ;;  %v3982_v34 = vld [vmem:[#allocation2 + $0x328] sm:$0xff]   ;;  %v3983_v37 = vld [vmem:[#allocation2 + $0x398] sm:$0xff]  }
 0x58f   :  { %3737 = vmatprep.subr.bf16.mxu0 %v4345_v28  ;;  %3468 = vmatprep.subr.bf16.mxu1 %v3978_v30  ;;  %v3987_v38 = vld [vmem:[#allocation2 + $0x358] sm:$0xff]   ;;  %v3986_v39 = vld [vmem:[#allocation2 + $0x390] sm:$0xff]   ;;  %v3989_v42 = vld [vmem:[#allocation2 + $0x388] sm:$0xff]  }
 0x590   :  { %3469 = vmatpush3.bf16.msra.mxu1 %v3979_v31  ;;  %v3988_v40 = vld [vmem:[#allocation2 + $0x318] sm:$0xff]   ;;  %v3990_v41 = vld [vmem:[#allocation2 + $0x350] sm:$0xff]   ;;  %v3993_v44 = vld [vmem:[#allocation2 + $0x348] sm:$0xff]  }
 0x591   :  { %3470 = vmatprep.subr.bf16.mxu1 %v3981_v33  ;;  %v3991_v43 = vld [vmem:[#allocation2 + $0x310] sm:$0xff]   ;;  %v3994_v45 = vld [vmem:[#allocation2 + $0x308] sm:$0xff]   ;;  %v3992_v46 = vld [vmem:[#allocation2 + $0x380] sm:$0xff]  }
 0x592   :  { %3738 = vmatpush3.bf16.msra.mxu0 %v3977_v29  ;;  %v3995_v47 = vld [vmem:[#allocation2 + $0x378] sm:$0xff]   ;;  %v3996_v48 = vld [vmem:[#allocation2 + $0x340] sm:$0xff]  }
 0x593   :  { %3739 = vmatprep.subr.bf16.mxu0 %v4345_v28  ;;  %v3997_v49 = vld [vmem:[#allocation2 + $0x300] sm:$0xff]   ;;  %v3998_v50 = vld [vmem:[#allocation2 + $0x338] sm:$0xff]  }
 0x594   :  { %3471 = vmatpush3.bf16.msra.mxu1 %v3982_v34  ;;  %v3999_v51 = vld [vmem:[#allocation2 + $0x2f8] sm:$0xff]  }
 0x595   :  { %3472 = vmatprep.subr.bf16.mxu1 %v3984_v35 }
 0x596   :  { %3740 = vmatpush3.bf16.msra.mxu0 %v3980_v32 }
 0x597   :  { %3741 = vmatprep.subr.bf16.mxu0 %v4345_v28 }
 0x598   :  { %3473 = vmatpush3.bf16.msra.mxu1 %v3985_v36 }
 0x599   :  { %3474 = vmatprep.subr.bf16.mxu1 %v3987_v38 }
 0x59a   :  { %3742 = vmatpush3.bf16.msra.mxu0 %v3983_v37 }
 0x59b   :  { %3743 = vmatprep.subr.bf16.mxu0 %v4345_v28 }
 0x59c   :  { %3475 = vmatpush3.bf16.msra.mxu1 %v3988_v40 }
 0x59d   :  { %3476 = vmatprep.subr.bf16.mxu1 %v3990_v41 }
 0x59e   :  { %3744 = vmatpush3.bf16.msra.mxu0 %v3986_v39 }
 0x59f   :  { %3745 = vmatprep.subr.bf16.mxu0 %v4345_v28 }
 0x5a0   :  { %3477 = vmatpush3.bf16.msra.mxu1 %v3991_v43 }
 0x5a1   :  { %3478 = vmatprep.subr.bf16.mxu1 %v3993_v44 }
 0x5a2   :  { %3746 = vmatpush3.bf16.msra.mxu0 %v3989_v42 }
 0x5a3   :  { %3747 = vmatprep.subr.bf16.mxu0 %v4345_v28 }
 0x5a4   :  { %3479 = vmatpush3.bf16.msra.mxu1 %v3994_v45 }
 0x5a5   :  { %3480 = vmatprep.subr.bf16.mxu1 %v3996_v48 }
 0x5a6   :  { %3748 = vmatpush3.bf16.msra.mxu0 %v3992_v46 }
 0x5a7   :  { %3749 = vmatprep.subr.bf16.mxu0 %v4345_v28 }
 0x5a8   :  { %3481 = vmatpush3.bf16.msra.mxu1 %v3997_v49 }
 0x5a9   :  { %3482 = vmatprep.subr.bf16.mxu1 %v3998_v50 }
 0x5aa   :  { %3750 = vmatpush3.bf16.msra.mxu0 %v3995_v47 }
 0x5ac   :  { %3483 = vmatpush3.bf16.msra.mxu1 %v3999_v51 }
 0x64d   :  { %v3733_v52 = vpop.f32.mrf.mxu0 }
 0x64e   :  { %v1689_v53 = vpack.c.bf16 %v3733_v52, %v3733_v52 }
 0x64f   :  { %v1673_v54 = vpop.f32.mrf.mxu0 }
 0x650   :  { %3752 = vmatmul.mubr.bf16.vlgmr.msra.gmra.mxu0 %v1689_v53  ;;  %v1687_v58 = vpack.c.bf16 %v1673_v54, %v1673_v54 }
 0x651   :  { %v3734_v55 = vpop.f32.mrf.mxu0 }
 0x653   :  { %v1676_v56 = vpop.f32.mrf.mxu0 }
 0x654   :  { %v1688_v57 = vpack.c.bf16 %v1676_v56, %v1676_v56 }
 0x656   :  { %1871 = vmatprep.mubr.bf16.mxu1 %v1688_v57 }
 0x657   :  { %1872 = vmatmul.mubr.bf16.vlgmr.msra.gmra.mxu1 %v1687_v58 }
 0x710   :  { %v1913_v59 = vpop.f32.mrf.mxu0 }
 0x712   :  { %v3753_v60 = vpop.f32.mrf.mxu0 }
 0x714   :  { %v1916_v61 = vpop.f32.mrf.mxu0 }
 0x716   :  { %v3754_v62 = vpop.f32.mrf.mxu0 }
 0x717   :  { %v3484_v63 = vpop.f32.mrf.mxu1 }
 0x719   :  { %v3485_v1 = vpop.f32.mrf.mxu1 }
 0x71a   :  { %v3486_v2 = vadd.f32 %v3485_v1, %v3484_v63 }
 0x71b   :  { %v3487_v3 = vpop.f32.mrf.mxu1 }
 0x71c   :  { %v1874_v4 = vadd.f32 %v3486_v2, %v3193_v0 }
 0x71d   :  { %v3488_v5 = vpop.f32.mrf.mxu1 }
 0x71e   :  { %v1914_v6 = vadd.f32 %v1913_v59, %v1874_v4 }
 0x720   :  { %v1919_v7 = vmax.f32 %v1914_v6, 0.0 }
 0x722   :  { %v1920_v8 = vpack.c.bf16 %v1919_v7, %v1919_v7 }
 0x723   :  { %4326 = dma.done.wait [#allocation3 + $0x4], 3328 }
 0x724   :  { %4327 = vsyncadd [#allocation3 + $0x4], 4294963968  ;;  %s1923_s22 = scalar_lea.hbm %s4584_s2, 20736  ;;  %vm2003_vm4 = vcmask 1043456   ;;  %s4348_s23 = smov [#allocation2 + $0x510]  }
 0x725   :  { %s1933_s24 = sshll.u32 %s4348_s23, 4  ;;  %3859 = vmatprep.subr.msk.bf16.mxu1 %vm2003_vm4, %v1920_v8  ;;  %v2005_v9 = vsel %vm2003_vm4, %v1920_v8, 0  ;;  %s1934_s24 = int_to_ptr.vmem [resolvable:$true] %s1933_s24 }
 0x726   :  { %3756 = vmatpush3.bf16.msra.mxu1 %v2005_v9  ;;  %s4216_s25 = scalar_lea.vmem %s1934_s24, 512  ;;  %p4221_p3 = scmp.lt.s32.totalorder %s1934_s24, %s4376_s16 }
 0x727   :  { %p4217_p2 = scmp.ne.s32.totalorder %s1934_s24, %s4216_s25  ;;  %p4222_p4 = scmp.lt.s32.totalorder %s4381_s20, %s4216_s25 }
 0x729   :  { %p4223_p5 = por %p4222_p4, %p4221_p3 }
 0x72b   :  { %p4224_p6 = pnand %p4223_p5, %p4217_p2 }
 0x72d   :  { %4227 = shalt.err (!%p4224_p6)  }
 0x72e   :  { %1936 = dma.hbm_to_vmem [thread:$0]  %s1923_s22, 512, %s1934_s24, [#allocation3 + $0x6]  ;;  %3761 = vmatprep.subr.bf16.mxu1 %v4345_v28  ;;  %vm1996_vm5 = vcmask 64512   ;;  %v3222_v49 = vld [vmem:[%s4583_s1 + $0x4] ss:$0 sm:$0xff] }
 0x72f   :  { %v4000_v10 = vld [vmem:[#allocation2 + $0x3b8] sm:$0xff]   ;;  %v4001_v11 = vld [vmem:[#allocation2 + $0x3c0] ss:$0 sps:$4 sm:$0xff]   ;;  %v4006_v16 = vld [vmem:[#allocation2 + $0x470] sm:$0xff]  }
 0x730   :  { %3757 = vmatprep.mubr.msk.bf16.mxu1 %vm1996_vm5, %v4000_v10  ;;  %v4002_v12 = vld [vmem:[#allocation2 + $0x480] sm:$0xff]   ;;  %v4003_v13 = vld [vmem:[#allocation2 + $0x478] sm:$0xff]   ;;  %v4010_v19 = vld [vmem:[#allocation2 + $0x430] sm:$0xff]  }
 0x731   :  { %3758 = vmatmul.mubr.msk.bf16.vlgmr.msra.gmra.mxu1 %vm1996_vm5, %v4001_v11  ;;  %v4004_v14 = vld [vmem:[#allocation2 + $0x440] sm:$0xff]   ;;  %v4007_v17 = vld [vmem:[#allocation2 + $0x438] sm:$0xff]   ;;  %v4011_v20 = vld [vmem:[#allocation2 + $0x3f0] sm:$0xff]  }
 0x732   :  { %3762 = vmatpush3.bf16.msra.mxu1 %v4002_v12  ;;  %3777 = vmatprep.mubr.msk.bf16.mxu1 %vm4346_vm1, %v4345_v28  ;;  %v4005_v15 = vld [vmem:[#allocation2 + $0x400] sm:$0xff]   ;;  %v4008_v18 = vld [vmem:[#allocation2 + $0x3f8] sm:$0xff]   ;;  %v4009_v21 = vld [vmem:[#allocation2 + $0x468] sm:$0xff]  }
 0x733   :  { %3763 = vmatprep.subr.bf16.mxu1 %v4345_v28  ;;  %3502 = vmatprep.subr.bf16.mxu0 %v4004_v14  ;;  %v4013_v22 = vld [vmem:[#allocation2 + $0x428] sm:$0xff]   ;;  %v4012_v23 = vld [vmem:[#allocation2 + $0x460] sm:$0xff]   ;;  %v4015_v26 = vld [vmem:[#allocation2 + $0x458] sm:$0xff]  }
 0x734   :  { %3503 = vmatpush3.bf16.msra.mxu0 %v4005_v15  ;;  %v4014_v24 = vld [vmem:[#allocation2 + $0x3e8] sm:$0xff]   ;;  %v4016_v25 = vld [vmem:[#allocation2 + $0x420] sm:$0xff]   ;;  %v4019_v29 = vld [vmem:[#allocation2 + $0x418] sm:$0xff]  }
 0x735   :  { %3504 = vmatprep.subr.bf16.mxu0 %v4007_v17  ;;  %v4017_v27 = vld [vmem:[#allocation2 + $0x3e0] sm:$0xff]   ;;  %v4020_v30 = vld [vmem:[#allocation2 + $0x3d8] sm:$0xff]   ;;  %v4018_v31 = vld [vmem:[#allocation2 + $0x450] sm:$0xff]  }
 0x736   :  { %3764 = vmatpush3.bf16.msra.mxu1 %v4003_v13  ;;  %v4021_v32 = vld [vmem:[#allocation2 + $0x448] sm:$0xff]   ;;  %v4022_v33 = vld [vmem:[#allocation2 + $0x410] sm:$0xff]  }
 0x737   :  { %3765 = vmatprep.subr.bf16.mxu1 %v4345_v28  ;;  %v4023_v34 = vld [vmem:[#allocation2 + $0x3d0] sm:$0xff]   ;;  %v4024_v35 = vld [vmem:[#allocation2 + $0x408] sm:$0xff]  }
 0x738   :  { %3505 = vmatpush3.bf16.msra.mxu0 %v4008_v18  ;;  %v4025_v36 = vld [vmem:[#allocation2 + $0x3c8] sm:$0xff]  }
 0x739   :  { %3506 = vmatprep.subr.bf16.mxu0 %v4010_v19 }
 0x73a   :  { %3766 = vmatpush3.bf16.msra.mxu1 %v4006_v16 }
 0x73b   :  { %3767 = vmatprep.subr.bf16.mxu1 %v4345_v28 }
 0x73c   :  { %3507 = vmatpush3.bf16.msra.mxu0 %v4011_v20 }
 0x73d   :  { %3508 = vmatprep.subr.bf16.mxu0 %v4013_v22 }
 0x73e   :  { %3768 = vmatpush3.bf16.msra.mxu1 %v4009_v21 }
 0x73f   :  { %3769 = vmatprep.subr.bf16.mxu1 %v4345_v28 }
 0x740   :  { %3509 = vmatpush3.bf16.msra.mxu0 %v4014_v24 }
 0x741   :  { %3510 = vmatprep.subr.bf16.mxu0 %v4016_v25 }
 0x742   :  { %3770 = vmatpush3.bf16.msra.mxu1 %v4012_v23 }
 0x743   :  { %3771 = vmatprep.subr.bf16.mxu1 %v4345_v28 }
 0x744   :  { %3511 = vmatpush3.bf16.msra.mxu0 %v4017_v27 }
 0x745   :  { %3512 = vmatprep.subr.bf16.mxu0 %v4019_v29 }
 0x746   :  { %3772 = vmatpush3.bf16.msra.mxu1 %v4015_v26 }
 0x747   :  { %3773 = vmatprep.subr.bf16.mxu1 %v4345_v28 }
 0x748   :  { %3513 = vmatpush3.bf16.msra.mxu0 %v4020_v30 }
 0x749   :  { %3514 = vmatprep.subr.bf16.mxu0 %v4022_v33 }
 0x74a   :  { %3774 = vmatpush3.bf16.msra.mxu1 %v4018_v31 }
 0x74b   :  { %3775 = vmatprep.subr.bf16.mxu1 %v4345_v28 }
 0x74c   :  { %3515 = vmatpush3.bf16.msra.mxu0 %v4023_v34 }
 0x74d   :  { %3516 = vmatprep.subr.bf16.mxu0 %v4024_v35 }
 0x74e   :  { %3776 = vmatpush3.bf16.msra.mxu1 %v4021_v32 }
 0x750   :  { %3517 = vmatpush3.bf16.msra.mxu0 %v4025_v36 }
 0x7f1   :  { %v3759_v37 = vpop.f32.mrf.mxu1 }
 0x7f2   :  { %v2057_v38 = vpack.c.bf16 %v3759_v37, %v3759_v37 }
 0x7f3   :  { %v2041_v39 = vpop.f32.mrf.mxu1 }
 0x7f4   :  { %3778 = vmatmul.mubr.bf16.vlgmr.msra.gmra.mxu1 %v2057_v38  ;;  %v2055_v43 = vpack.c.bf16 %v2041_v39, %v2041_v39 }
 0x7f5   :  { %v3760_v40 = vpop.f32.mrf.mxu1 }
 0x7f7   :  { %v2044_v41 = vpop.f32.mrf.mxu1 }
 0x7f8   :  { %v2056_v42 = vpack.c.bf16 %v2044_v41, %v2044_v41 }
 0x7fa   :  { %2239 = vmatprep.mubr.bf16.mxu0 %v2056_v42 }
 0x7fb   :  { %2240 = vmatmul.mubr.bf16.vlgmr.msra.gmra.mxu0 %v2055_v43 }
 0x8b4   :  { %v2281_v44 = vpop.f32.mrf.mxu1 }
 0x8b6   :  { %v3779_v45 = vpop.f32.mrf.mxu1 }
 0x8b8   :  { %v2284_v46 = vpop.f32.mrf.mxu1 }
 0x8ba   :  { %v3780_v47 = vpop.f32.mrf.mxu1 }
 0x8bb   :  { %v3518_v48 = vpop.f32.mrf.mxu0 }
 0x8bd   :  { %v3519_v50 = vpop.f32.mrf.mxu0 }
 0x8be   :  { %v3520_v51 = vadd.f32 %v3519_v50, %v3518_v48 }
 0x8bf   :  { %v3521_v52 = vpop.f32.mrf.mxu0 }
 0x8c0   :  { %v2242_v53 = vadd.f32 %v3520_v51, %v3222_v49 }
 0x8c1   :  { %v3522_v54 = vpop.f32.mrf.mxu0 }
 0x8c2   :  { %v2282_v55 = vadd.f32 %v2281_v44, %v2242_v53 }
 0x8c4   :  { %v2287_v56 = vmax.f32 %v2282_v55, 0.0 }
 0x8c6   :  { %v2288_v57 = vpack.c.bf16 %v2287_v56, %v2287_v56 }
 0x8c7   :  { %4328 = dma.done.wait [#allocation3 + $0x5], 2176 }
 0x8c8   :  { %4329 = vsyncadd [#allocation3 + $0x5], 4294965120  ;;  %s2293_s30 = scalar_lea.hbm %s4584_s2, 21248  ;;  %3781 = vmatprep.subr.bf16.mxu0 %v4345_v28  ;;  %v2350_v58 = vsel %vm2003_vm4, %v2288_v57, 0  ;;  %3783 = vmatprep.mubr.msk.bf16.mxu0 %vm4346_vm1, %v4345_v28  ;;  %s4349_s4 = smov [#allocation2 + $0x530]  }
 0x8c9   :  { %s2303_s5 = sshll.u32 %s4349_s4, 4  ;;  %3782 = vmatpush3.bf16.msra.mxu0 %v2350_v58  ;;  %s2304_s5 = int_to_ptr.vmem [resolvable:$true] %s2303_s5 }
 0x8ca   :  { %s4239_s6 = scalar_lea.vmem %s2304_s5, 1024  ;;  %p4244_p8 = scmp.lt.s32.totalorder %s2304_s5, %s4376_s16 }
 0x8cb   :  { %p4240_p7 = scmp.ne.s32.totalorder %s2304_s5, %s4239_s6  ;;  %p4245_p9 = scmp.lt.s32.totalorder %s4381_s20, %s4239_s6 }
 0x8cd   :  { %p4246_p10 = por %p4245_p9, %p4244_p8 }
 0x8cf   :  { %p4247_p11 = pnand %p4246_p10, %p4240_p7 }
 0x8d1   :  { %4250 = shalt.err (!%p4247_p11)  }
 0x8d2   :  { %2306 = dma.hbm_to_vmem [thread:$0]  %s2293_s30, 1024, %s2304_s5, [#allocation3 + $0x7]  ;;  %v3249_v19 = vld [vmem:[%s4583_s1 + $0x5] ss:$0 sm:$0xff] }
 0x8d3   :  { %v4026_v59 = vld [vmem:[#allocation2 + $0x488] sm:$0xff]   ;;  %v4029_v62 = vld [vmem:[#allocation2 + $0x500] sm:$0xff]   ;;  %v4031_v0 = vld [vmem:[#allocation2 + $0x4f8] sm:$0xff]  }
 0x8d4   :  { %v4027_v60 = vld [vmem:[#allocation2 + $0x508] sm:$0xff]   ;;  %3784 = vmatmul.mubr.msk.bf16.vlgmr.msra.gmra.mxu0 %vm1996_vm5, %v4026_v59  ;;  %v4030_v63 = vld [vmem:[#allocation2 + $0x4c0] sm:$0xff]   ;;  %v4032_v1 = vld [vmem:[#allocation2 + $0x4b8] sm:$0xff]  }
 0x8d5   :  { %v4028_v61 = vld [vmem:[#allocation2 + $0x4c8] sm:$0xff]   ;;  %3535 = vmatprep.subr.bf16.mxu1 %v4027_v60  ;;  %v4033_v2 = vld [vmem:[#allocation2 + $0x4f0] sm:$0xff]   ;;  %v4037_v6 = vld [vmem:[#allocation2 + $0x4e0] sm:$0xff]  }
 0x8d6   :  { %3536 = vmatpush3.bf16.msra.mxu1 %v4028_v61  ;;  %v4034_v3 = vld [vmem:[#allocation2 + $0x4b0] sm:$0xff]   ;;  %v4035_v4 = vld [vmem:[#allocation2 + $0x4e8] sm:$0xff]   ;;  %v4038_v7 = vld [vmem:[#allocation2 + $0x4a0] sm:$0xff]  }
 0x8d7   :  { %3537 = vmatprep.subr.bf16.mxu1 %v4029_v62  ;;  %v4036_v5 = vld [vmem:[#allocation2 + $0x4a8] sm:$0xff]   ;;  %v4039_v8 = vld [vmem:[#allocation2 + $0x4d8] sm:$0xff]   ;;  %v4041_v10 = vld [vmem:[#allocation2 + $0x4d0] sm:$0xff]  }
 0x8d8   :  { %v4040_v9 = vld [vmem:[#allocation2 + $0x498] sm:$0xff]   ;;  %v4042_v11 = vld [vmem:[#allocation2 + $0x490] sm:$0xff]  }
 0x8da   :  { %3538 = vmatpush3.bf16.msra.mxu1 %v4030_v63 }
 0x8db   :  { %3539 = vmatprep.subr.bf16.mxu1 %v4031_v0 }
 0x8de   :  { %3540 = vmatpush3.bf16.msra.mxu1 %v4032_v1 }
 0x8df   :  { %3541 = vmatprep.subr.bf16.mxu1 %v4033_v2 }
 0x8e2   :  { %3542 = vmatpush3.bf16.msra.mxu1 %v4034_v3 }
 0x8e3   :  { %3543 = vmatprep.subr.bf16.mxu1 %v4035_v4 }
 0x8e6   :  { %3544 = vmatpush3.bf16.msra.mxu1 %v4036_v5 }
 0x8e7   :  { %3545 = vmatprep.subr.bf16.mxu1 %v4037_v6 }
 0x8ea   :  { %3546 = vmatpush3.bf16.msra.mxu1 %v4038_v7 }
 0x8eb   :  { %3547 = vmatprep.subr.bf16.mxu1 %v4039_v8 }
 0x8ee   :  { %3548 = vmatpush3.bf16.msra.mxu1 %v4040_v9 }
 0x8ef   :  { %3549 = vmatprep.subr.bf16.mxu1 %v4041_v10 }
 0x8f2   :  { %3550 = vmatpush3.bf16.msra.mxu1 %v4042_v11 }
 0x994   :  { %v2386_v12 = vpop.f32.mrf.mxu0 }
 0x995   :  { %v2393_v16 = vpack.c.bf16 %v2386_v12, %v2386_v12 }
 0x996   :  { %v3785_v13 = vpop.f32.mrf.mxu0 }
 0x998   :  { %v2389_v14 = vpop.f32.mrf.mxu0 }
 0x999   :  { %v2394_v15 = vpack.c.bf16 %v2389_v14, %v2389_v14 }
 0x99a   :  { %v3786_v17 = vpop.f32.mrf.mxu0 }
 0x99b   :  { %2528 = vmatprep.mubr.bf16.mxu1 %v2394_v15 }
 0x99c   :  { %2529 = vmatmul.mubr.bf16.vlgmr.msra.gmra.mxu1 %v2393_v16 }
 0xa5c   :  { %v3551_v18 = vpop.f32.mrf.mxu1 }
 0xa5e   :  { %v3552_v20 = vpop.f32.mrf.mxu1 }
 0xa5f   :  { %v3553_v21 = vadd.f32 %v3552_v20, %v3551_v18 }
 0xa60   :  { %v3554_v22 = vpop.f32.mrf.mxu1 }
 0xa61   :  { %v2531_v23 = vadd.f32 %v3553_v21, %v3249_v19 }
 0xa62   :  { %v3555_v24 = vpop.f32.mrf.mxu1 }
 0xa63   :  { %v2536_v25 = vmax.f32 %v2531_v23, 0.0 }
 0xa65   :  { %v2537_v26 = vpack.c.bf16 %v2536_v25, %v2536_v25 }
 0xa66   :  { %4330 = dma.done.wait [#allocation3 + $0x6], 512 }
 0xa67   :  { %4331 = vsyncadd [#allocation3 + $0x6], 4294966784  ;;  %s2542_s11 = scalar_lea.hbm %s4584_s2, 22272  ;;  %3787 = vmatprep.subr.bf16.mxu0 %v4345_v28  ;;  %3795 = vmatprep.mubr.msk.bf16.mxu0 %vm4346_vm1, %v4345_v28  ;;  %s4350_s12 = smov [#allocation2 + $0x570]  }
 0xa68   :  { %s2552_s13 = sshll.u32 %s4350_s12, 4  ;;  %s2553_s13 = int_to_ptr.vmem [resolvable:$true] %s2552_s13 }
 0xa69   :  { %s4262_s14 = scalar_lea.vmem %s2553_s13, 1024  ;;  %p4267_p13 = scmp.lt.s32.totalorder %s2553_s13, %s4376_s16 }
 0xa6a   :  { %p4263_p12 = scmp.ne.s32.totalorder %s2553_s13, %s4262_s14  ;;  %p4268_p0 = scmp.lt.s32.totalorder %s4381_s20, %s4262_s14 }
 0xa6c   :  { %p4269_p1 = por %p4268_p0, %p4267_p13 }
 0xa6e   :  { %p4270_p2 = pnand %p4269_p1, %p4263_p12 }
 0xa70   :  { %4273 = shalt.err (!%p4270_p2)  }
 0xa71   :  { %2555 = dma.hbm_to_vmem [thread:$0]  %s2542_s11, 1024, %s2553_s13, [#allocation3 + $0x8]  ;;  %v3266_v32 = vld [vmem:[%s4583_s1 + $0x6] ss:$0 sm:$0xff] }
 0xa72   :  { %v4043_v27 = vld [vmem:[#allocation2 + $0x528] sm:$0xff]   ;;  %v4044_v29 = vld [vmem:[#allocation2 + $0x520] sm:$0xff]   ;;  %v4045_v30 = vld [vmem:[#allocation2 + $0x518] sm:$0xff]  }
 0xa73   :  { %3788 = vmatpush3.bf16.msra.mxu0 %v4043_v27  ;;  %v4046_v31 = vld [vmem:[#allocation2 + $0x510] sm:$0xff]  }
 0xa74   :  { %3789 = vmatprep.subr.bf16.mxu0 %v4345_v28 }
 0xa77   :  { %3790 = vmatpush3.bf16.msra.mxu0 %v4044_v29 }
 0xa78   :  { %3791 = vmatprep.subr.bf16.mxu0 %v4345_v28 }
 0xa7b   :  { %3792 = vmatpush3.bf16.msra.mxu0 %v4045_v30 }
 0xa7c   :  { %3793 = vmatprep.subr.bf16.mxu0 %v4345_v28 }
 0xa7f   :  { %3794 = vmatpush3.bf16.msra.mxu0 %v4046_v31 }
 0xa82   :  { %3796 = vmatmul.mubr.msk.bf16.vlgmr.msra.gmra.mxu0 %vm805_vm0, %v2537_v26 }
 0xb42   :  { %v2630_v33 = vpop.f32.mrf.mxu0 }
 0xb43   :  { %v2631_v34 = vadd.f32 %v3266_v32, %v2630_v33 }
 0xb44   :  { %v3797_v35 = vpop.f32.mrf.mxu0 }
 0xb45   :  { %v2636_v36 = vmax.f32 %v2631_v34, 0.0 }
 0xb46   :  { %v2633_v37 = vpop.f32.mrf.mxu0 }
 0xb47   :  { %v2637_v38 = vpack.c.bf16 %v2636_v36, %v2636_v36 }
 0xb48   :  { %v3798_v39 = vpop.f32.mrf.mxu0 }
 0xb49   :  { %4332 = dma.done.wait [#allocation3 + $0x7], 1024 }
 0xb4a   :  { %4333 = vsyncadd [#allocation3 + $0x7], 4294966272  ;;  %s2642_s0 = scalar_lea.hbm %s4584_s2, 23296  ;;  %3799 = vmatprep.subr.bf16.mxu0 %v4345_v28  ;;  %3815 = vmatprep.mubr.msk.bf16.mxu0 %vm4346_vm1, %v4345_v28  ;;  %s4351_s21 = smov [#allocation2 + $0x5b0]  }
 0xb4b   :  { %s2652_s22 = sshll.u32 %s4351_s21, 4  ;;  %s2653_s22 = int_to_ptr.vmem [resolvable:$true] %s2652_s22 }
 0xb4c   :  { %s4285_s23 = scalar_lea.vmem %s2653_s22, 1024  ;;  %p4290_p4 = scmp.lt.s32.totalorder %s2653_s22, %s4376_s16 }
 0xb4d   :  { %p4286_p3 = scmp.ne.s32.totalorder %s2653_s22, %s4285_s23  ;;  %p4291_p5 = scmp.lt.s32.totalorder %s4381_s20, %s4285_s23 }
 0xb4f   :  { %p4292_p6 = por %p4291_p5, %p4290_p4 }
 0xb51   :  { %p4293_p7 = pnand %p4292_p6, %p4286_p3 }
 0xb53   :  { %4296 = shalt.err (!%p4293_p7)  }
 0xb54   :  { %2655 = dma.hbm_to_vmem [thread:$0]  %s2642_s0, 1024, %s2653_s22, [#allocation3 + $0x9]  ;;  %v3272_v48 = vld [vmem:[%s4583_s1 + $0x7] ss:$0 sm:$0xff] }
 0xb55   :  { %v4047_v40 = vld [vmem:[#allocation2 + $0x568] sm:$0xff]   ;;  %v4048_v41 = vld [vmem:[#allocation2 + $0x560] sm:$0xff]   ;;  %v4049_v42 = vld [vmem:[#allocation2 + $0x558] sm:$0xff]  }
 0xb56   :  { %3800 = vmatpush3.bf16.msra.mxu0 %v4047_v40  ;;  %v4050_v43 = vld [vmem:[#allocation2 + $0x550] sm:$0xff]   ;;  %v4051_v44 = vld [vmem:[#allocation2 + $0x548] sm:$0xff]   ;;  %v4052_v45 = vld [vmem:[#allocation2 + $0x540] sm:$0xff]  }
 0xb57   :  { %3801 = vmatprep.subr.bf16.mxu0 %v4345_v28  ;;  %v4053_v46 = vld [vmem:[#allocation2 + $0x538] sm:$0xff]   ;;  %v4054_v47 = vld [vmem:[#allocation2 + $0x530] sm:$0xff]  }
 0xb5a   :  { %3802 = vmatpush3.bf16.msra.mxu0 %v4048_v41 }
 0xb5b   :  { %3803 = vmatprep.subr.bf16.mxu0 %v4345_v28 }
 0xb5e   :  { %3804 = vmatpush3.bf16.msra.mxu0 %v4049_v42 }
 0xb5f   :  { %3805 = vmatprep.subr.bf16.mxu0 %v4345_v28 }
 0xb62   :  { %3806 = vmatpush3.bf16.msra.mxu0 %v4050_v43 }
 0xb63   :  { %3807 = vmatprep.subr.bf16.mxu0 %v4345_v28 }
 0xb66   :  { %3808 = vmatpush3.bf16.msra.mxu0 %v4051_v44 }
 0xb67   :  { %3809 = vmatprep.subr.bf16.mxu0 %v4345_v28 }
 0xb6a   :  { %3810 = vmatpush3.bf16.msra.mxu0 %v4052_v45 }
 0xb6b   :  { %3811 = vmatprep.subr.bf16.mxu0 %v4345_v28 }
 0xb6e   :  { %3812 = vmatpush3.bf16.msra.mxu0 %v4053_v46 }
 0xb6f   :  { %3813 = vmatprep.subr.bf16.mxu0 %v4345_v28 }
 0xb72   :  { %3814 = vmatpush3.bf16.msra.mxu0 %v4054_v47 }
 0xb75   :  { %3816 = vmatmul.mubr.bf16.vlgmr.msra.gmra.mxu0 %v2637_v38 }
 0xc35   :  { %v2759_v49 = vpop.f32.mrf.mxu0 }
 0xc36   :  { %v2760_v50 = vadd.f32 %v3272_v48, %v2759_v49 }
 0xc37   :  { %v3817_v51 = vpop.f32.mrf.mxu0 }
 0xc38   :  { %v2765_v52 = vmax.f32 %v2760_v50, 0.0 }
 0xc39   :  { %v2762_v53 = vpop.f32.mrf.mxu0 }
 0xc3a   :  { %v2766_v54 = vpack.c.bf16 %v2765_v52, %v2765_v52 }
 0xc3b   :  { %v3818_v55 = vpop.f32.mrf.mxu0 }
 0xc3c   :  { %4334 = dma.done.wait [#allocation3 + $0x8], 1024 }
 0xc3d   :  { %4335 = vsyncadd [#allocation3 + $0x8], 4294966272  ;;  %3819 = vmatprep.subr.bf16.mxu1 %v4345_v28  ;;  %3835 = vmatprep.mubr.msk.bf16.mxu1 %vm4346_vm1, %v4345_v28  ;;  %v4055_v56 = vld [vmem:[#allocation2 + $0x5a8] sm:$0xff]   ;;  %v4056_v57 = vld [vmem:[#allocation2 + $0x5a0] sm:$0xff]  }
 0xc3e   :  { %3820 = vmatpush3.bf16.msra.mxu1 %v4055_v56  ;;  %v4057_v58 = vld [vmem:[#allocation2 + $0x598] sm:$0xff]   ;;  %v4058_v59 = vld [vmem:[#allocation2 + $0x590] sm:$0xff]   ;;  %v4059_v60 = vld [vmem:[#allocation2 + $0x588] sm:$0xff]  }
 0xc3f   :  { %3821 = vmatprep.subr.bf16.mxu1 %v4345_v28  ;;  %v4060_v61 = vld [vmem:[#allocation2 + $0x580] sm:$0xff]   ;;  %v4061_v62 = vld [vmem:[#allocation2 + $0x578] sm:$0xff]   ;;  %v4062_v63 = vld [vmem:[#allocation2 + $0x570] sm:$0xff]  }
 0xc40   :  { %v3281_v0 = vld [vmem:[%s4583_s1 + $0x8] ss:$0 sm:$0xff] }
 0xc42   :  { %3822 = vmatpush3.bf16.msra.mxu1 %v4056_v57 }
 0xc43   :  { %3823 = vmatprep.subr.bf16.mxu1 %v4345_v28 }
 0xc46   :  { %3824 = vmatpush3.bf16.msra.mxu1 %v4057_v58 }
 0xc47   :  { %3825 = vmatprep.subr.bf16.mxu1 %v4345_v28 }
 0xc4a   :  { %3826 = vmatpush3.bf16.msra.mxu1 %v4058_v59 }
 0xc4b   :  { %3827 = vmatprep.subr.bf16.mxu1 %v4345_v28 }
 0xc4e   :  { %3828 = vmatpush3.bf16.msra.mxu1 %v4059_v60 }
 0xc4f   :  { %3829 = vmatprep.subr.bf16.mxu1 %v4345_v28 }
 0xc52   :  { %3830 = vmatpush3.bf16.msra.mxu1 %v4060_v61 }
 0xc53   :  { %3831 = vmatprep.subr.bf16.mxu1 %v4345_v28 }
 0xc56   :  { %3832 = vmatpush3.bf16.msra.mxu1 %v4061_v62 }
 0xc57   :  { %3833 = vmatprep.subr.bf16.mxu1 %v4345_v28 }
 0xc5a   :  { %3834 = vmatpush3.bf16.msra.mxu1 %v4062_v63 }
 0xc5d   :  { %3836 = vmatmul.mubr.bf16.vlgmr.msra.gmra.mxu1 %v2766_v54 }
 0xd1d   :  { %v2872_v1 = vpop.f32.mrf.mxu1 }
 0xd1e   :  { %v2873_v2 = vadd.f32 %v3281_v0, %v2872_v1 }
 0xd1f   :  { %v3837_v3 = vpop.f32.mrf.mxu1 }
 0xd20   :  { %v2878_v4 = vmax.f32 %v2873_v2, 0.0 }
 0xd21   :  { %v2875_v5 = vpop.f32.mrf.mxu1 }
 0xd22   :  { %v2879_v6 = vpack.c.bf16 %v2878_v4, %v2878_v4 }
 0xd23   :  { %v3838_v7 = vpop.f32.mrf.mxu1 }
 0xd24   :  { %4336 = dma.done.wait [#allocation3 + $0x9], 1024 }
 0xd25   :  { %4337 = vsyncadd [#allocation3 + $0x9], 4294966272  ;;  %3839 = vmatprep.subr.bf16.mxu0 %v4345_v28  ;;  %3855 = vmatprep.mubr.msk.bf16.mxu0 %vm4346_vm1, %v4345_v28  ;;  %v4063_v8 = vld [vmem:[#allocation2 + $0x5e8] sm:$0xff]   ;;  %v4064_v9 = vld [vmem:[#allocation2 + $0x5e0] sm:$0xff]   ;;  %s4352_s27 = smov [#allocation4]   ;;  %vm2991_vm6 = vcmask 156672  }
 0xd26   :  { %3840 = vmatpush3.bf16.msra.mxu0 %v4063_v8  ;;  %v4065_v10 = vld [vmem:[#allocation2 + $0x5d8] sm:$0xff]   ;;  %v4066_v11 = vld [vmem:[#allocation2 + $0x5d0] sm:$0xff]   ;;  %v4067_v12 = vld [vmem:[#allocation2 + $0x5c8] sm:$0xff]   ;;  %s2999_s28 = sshll.u32 %s4352_s27, 4  ;;  %s3000_s28 = int_to_ptr.vmem [resolvable:$true] %s2999_s28 }
 0xd27   :  { %3841 = vmatprep.subr.bf16.mxu0 %v4345_v28  ;;  %v4068_v13 = vld [vmem:[#allocation2 + $0x5c0] sm:$0xff]   ;;  %v4069_v14 = vld [vmem:[#allocation2 + $0x5b8] sm:$0xff]   ;;  %v4070_v15 = vld [vmem:[#allocation2 + $0x5b0] sm:$0xff]   ;;  %s4298_s29 = scalar_lea.vmem %s3000_s28, 32  ;;  %p4303_p9 = scmp.lt.s32.totalorder %s3000_s28, %s3000_s28 }
 0xd28   :  { %v3290_v16 = vld [vmem:[%s4583_s1 + $0x9] ss:$0 sm:$0xff]  ;;  %p4299_p8 = scmp.ne.s32.totalorder %s3000_s28, %s4298_s29  ;;  %p4304_p10 = scmp.lt.s32.totalorder %s4298_s29, %s4298_s29 }
 0xd2a   :  { %3842 = vmatpush3.bf16.msra.mxu0 %v4064_v9  ;;  %p4305_p11 = por %p4304_p10, %p4303_p9 }
 0xd2b   :  { %3843 = vmatprep.subr.bf16.mxu0 %v4345_v28 }
 0xd2c   :  { %p4306_p12 = pnand %p4305_p11, %p4299_p8 }
 0xd2e   :  { %3844 = vmatpush3.bf16.msra.mxu0 %v4065_v10 }
 0xd2f   :  { %3845 = vmatprep.subr.bf16.mxu0 %v4345_v28 }
 0xd32   :  { %3846 = vmatpush3.bf16.msra.mxu0 %v4066_v11 }
 0xd33   :  { %3847 = vmatprep.subr.bf16.mxu0 %v4345_v28 }
 0xd36   :  { %3848 = vmatpush3.bf16.msra.mxu0 %v4067_v12 }
 0xd37   :  { %3849 = vmatprep.subr.bf16.mxu0 %v4345_v28 }
 0xd3a   :  { %3850 = vmatpush3.bf16.msra.mxu0 %v4068_v13 }
 0xd3b   :  { %3851 = vmatprep.subr.bf16.mxu0 %v4345_v28 }
 0xd3e   :  { %3852 = vmatpush3.bf16.msra.mxu0 %v4069_v14 }
 0xd3f   :  { %3853 = vmatprep.subr.bf16.mxu0 %v4345_v28 }
 0xd42   :  { %3854 = vmatpush3.bf16.msra.mxu0 %v4070_v15 }
 0xd45   :  { %3856 = vmatmul.mubr.bf16.vlgmr.msra.gmra.mxu0 %v2879_v6 }
 0xe05   :  { %v2985_v17 = vpop.f32.mrf.mxu0 }
 0xe06   :  { %v2986_v18 = vadd.f32 %v3290_v16, %v2985_v17 }
 0xe07   :  { %v3857_v19 = vpop.f32.mrf.mxu0 }
 0xe08   :  { %2992 = vst.msk [vmem:[#allocation4] sm:$0x3] %vm2991_vm6, %v2986_v18 }
 0xe09   :  { %v2988_v20 = vpop.f32.mrf.mxu0 }
 0xe0a   :  { %4309 = shalt.err (!%p4306_p12)
}
 0xe0b   :  { %3002 = dma.vmem_to_hbm [thread:$0]  %s3000_s28, 32, %s4585_s3, [#allocation5]   ;;  %v3858_v28 = vpop.f32.mrf.mxu0 }
 0xe0c   :  { %4338 = dma.done.wait [#allocation5], 32  }
 0xe0d   :  { %4339 = vsyncadd [#allocation5], 4294967264 }
 0xe0e   :  { %3006 = vsyncpa [#allocation5], 1 }
 0xe0f   :  { %3007 = vsyncmov [#allocation3] }
 0xe12   :  { %s3008_s1 = vpop.sfrf %3007 }
 0xe13   :  { %p3299_p13 = scmp.ne.s32.totalorder %s3008_s1, 0 }
 0xe15   :  { %3012 = shalt.err (%p3299_p13)  }
 0xe16   :  { %3014 = vsyncmov [#allocation3 + $0x1] }
 0xe19   :  { %s3015_s5 = vpop.sfrf %3014 }
 0xe1a   :  { %p3300_p0 = scmp.ne.s32.totalorder %s3015_s5, 0 }
 0xe1c   :  { %3019 = shalt.err (%p3300_p0)  }
 0xe1d   :  { %3021 = vsyncmov [#allocation3 + $0x2] }
 0xe20   :  { %s3022_s6 = vpop.sfrf %3021 }
 0xe21   :  { %p3301_p1 = scmp.ne.s32.totalorder %s3022_s6, 0 }
 0xe23   :  { %3026 = shalt.err (%p3301_p1)  }
 0xe24   :  { %3028 = vsyncmov [#allocation3 + $0x3] }
 0xe27   :  { %s3029_s7 = vpop.sfrf %3028 }
 0xe28   :  { %p3302_p2 = scmp.ne.s32.totalorder %s3029_s7, 0 }
 0xe2a   :  { %3033 = shalt.err (%p3302_p2)  }
 0xe2b   :  { %3035 = vsyncmov [#allocation3 + $0x4] }
 0xe2e   :  { %s3036_s3 = vpop.sfrf %3035 }
 0xe2f   :  { %p3303_p3 = scmp.ne.s32.totalorder %s3036_s3, 0 }
 0xe31   :  { %3040 = shalt.err (%p3303_p3)  }
 0xe32   :  { %3042 = vsyncmov [#allocation3 + $0x5] }
 0xe35   :  { %s3043_s8 = vpop.sfrf %3042 }
 0xe36   :  { %p3304_p4 = scmp.ne.s32.totalorder %s3043_s8, 0 }
 0xe38   :  { %3047 = shalt.err (%p3304_p4)  }
 0xe39   :  { %3049 = vsyncmov [#allocation3 + $0x6] }
 0xe3c   :  { %s3050_s9 = vpop.sfrf %3049 }
 0xe3d   :  { %p3305_p5 = scmp.ne.s32.totalorder %s3050_s9, 0 }
 0xe3f   :  { %3054 = shalt.err (%p3305_p5)  }
 0xe40   :  { %3056 = vsyncmov [#allocation3 + $0x7] }
 0xe43   :  { %s3057_s10 = vpop.sfrf %3056 }
 0xe44   :  { %p3306_p6 = scmp.ne.s32.totalorder %s3057_s10, 0 }
 0xe46   :  { %3061 = shalt.err (%p3306_p6)  }
 0xe47   :  { %3063 = vsyncmov [#allocation3 + $0x8] }
 0xe4a   :  { %s3064_s11 = vpop.sfrf %3063 }
 0xe4b   :  { %p3307_p7 = scmp.ne.s32.totalorder %s3064_s11, 0 }
 0xe4d   :  { %3068 = shalt.err (%p3307_p7)  }
 0xe4e   :  { %3070 = vsyncmov [#allocation3 + $0x9] }
 0xe51   :  { %s3071_s12 = vpop.sfrf %3070 }
 0xe52   :  { %p3308_p8 = scmp.ne.s32.totalorder %s3071_s12, 0 }
 0xe54   :  { %3075 = shalt.err (%p3308_p8)  }

</bundles_post_ra>
